<compile_context>
chip_gen: v7x
topology: tpu7x:2x2x1
jax: 0.10.0
libtpu: 0.0.40
codegen_flags: <defaults>
</compile_context>

<pallas_src>
import functools

import numpy as np
import jax
import jax.numpy as jnp
from jax import lax
from jax.experimental import pallas as pl
from jax.experimental.pallas import tpu as pltpu

_MIB = 1024 * 1024


def hardest_triplet_kernel(feat_ref, lab_ref, out_ref, *, mp, mn):
    """One grid step: TB batch elements, all J instances.

    feat_ref : (TB, N, D) f32   features
    lab_ref  : (TB, J, N) i8    instance masks (0/1)
    out_ref  : (TB, 2, J) f32   row 0 = positive loss, row 1 = negative loss
    """
    x = feat_ref[...]                                              # (TB, N, D)
    TB = x.shape[0]
    J = lab_ref.shape[1]

    # ---- batched pairwise L2 distances (one MXU gram matmul) -----------------
    # HIGHEST kept on purpose: ||a||^2 + ||b||^2 - 2ab is cancellation-prone right
    # at the mp/mn thresholds; DEFAULT/bf16 flips borderline comparisons.
    gram = jnp.einsum("bnd,bmd->bnm", x, x,
                      preferred_element_type=jnp.float32,
                      precision=lax.Precision.HIGHEST)             # (TB, N, N)
    sq = jnp.sum(x * x, axis=-1)                                   # (TB, N)
    d2 = sq[:, :, None] + sq[:, None, :] - 2.0 * gram
    dist = jnp.sqrt(jnp.maximum(d2, 0.0) + 1e-7)                   # (TB, N, N)

    lab_i8 = lab_ref[...]                                          # (TB, J, N) int8 0/1
    lab_f32 = lab_i8.astype(jnp.float32)                           # matmul / sum operand

    # ---- positive term, all instances at once (rides the MXU) ----------------
    pos_margin = jnp.maximum(dist - mp, 0.0)
    pos_w = pos_margin * pos_margin                                # (TB, N, N) f32
    pos_hit = (dist > mp).astype(jnp.bfloat16)                     # exact 0/1 in bf16

    # sum over pos-pos pairs of instance j == diag(L @ W @ L^T), computed as
    # (L @ W) * L reduced over N, so the segment reduction rides the MXU.
    lw = jnp.einsum("bjn,bnm->bjm", lab_f32, pos_w,
                    preferred_element_type=jnp.float32,
                    precision=lax.Precision.HIGHEST)               # (TB, J, N)
    lc = jnp.einsum("bjn,bnm->bjm", lab_i8.astype(jnp.bfloat16), pos_hit,
                    preferred_element_type=jnp.float32,
                    precision=lax.Precision.DEFAULT)               # exact integer counts
    lp_sum = jnp.sum(lw * lab_f32, axis=-1)                        # (TB, J)
    lp_cnt = jnp.sum(lc * lab_f32, axis=-1)                        # (TB, J)

    # ---- negative term: hardest negative per anchor, per instance ------------
    # Loop over J keeps the live set at O(TB*N^2).  The per-iteration label-row
    # extraction is a cheap O(TB*J*N) one-hot reduce (no dynamic sublane slicing).
    big = jnp.float32(1e30)
    row_iota = lax.broadcasted_iota(jnp.int32, (1, J, 1), 1)       # (1, J, 1)
    col_iota = lax.broadcasted_iota(jnp.int32, (1, J), 1)          # (1, J)

    def body(j, carry):
        ln_sum, ln_cnt = carry
        lab_j = jnp.max(jnp.where(row_iota == j, lab_f32, 0.0), axis=1) > 0.5  # (TB, N)
        # hardest negative: min over columns NOT in instance j (overlap-safe).
        neg_hard = jnp.min(jnp.where(lab_j[:, None, :], big, dist), axis=-1)   # (TB, N)
        sel = jnp.logical_and(lab_j, neg_hard < mn)                            # (TB, N)
        margin = jnp.where(sel, mn - neg_hard, 0.0)        # select BEFORE squaring
        s_j = jnp.sum(margin * margin, axis=-1, keepdims=True)                 # (TB, 1)
        c_j = jnp.sum(sel.astype(jnp.float32), axis=-1, keepdims=True)         # (TB, 1)
        hit = col_iota == j                                                    # (1, J)
        return (jnp.where(hit, s_j, ln_sum), jnp.where(hit, c_j, ln_cnt))

    zeros = jnp.zeros((TB, J), jnp.float32)
    ln_sum, ln_cnt = lax.fori_loop(0, J, body, (zeros, zeros))

    # "if label[i][j].sum() < 10: continue"
    valid = jnp.sum(lab_f32, axis=-1) >= 10.0                      # (TB, J)
    zero = jnp.zeros_like(lp_sum)
    # Masked means: 0/0 -> NaN when an instance is valid but no pair is selected
    # (matches torch's mean-of-empty); the wrapper's ">0" masks drop those entries.
    lp_val = jnp.where(valid, lp_sum / lp_cnt, zero)
    ln_val = jnp.where(valid, ln_sum / ln_cnt, zero)

    # One static, lane-merged full-block store (single output DMA per step).
    out_ref[...] = jnp.concatenate([lp_val[:, None, :], ln_val[:, None, :]], axis=1)


def _tpu_generation_info():
    """Best-effort (VMEM capacity, TensorCores-per-chip) query with safe fallbacks."""
    vmem_cap = 64 * _MIB            # conservative default = v7x per-core VMEM
    n_cores = 1
    try:
        info = pltpu.get_tpu_info()
        vmem_cap = int(getattr(info, "vmem_capacity_bytes", vmem_cap))
    except Exception:
        pass
    try:
        kind = jax.devices()[0].device_kind.lower()
        if any(tag in kind for tag in ("v4", "v5p", "v7", "7x")):
            n_cores = 2             # megacore / dual-TensorCore chips
    except Exception:
        pass
    return vmem_cap, n_cores


def _estimate_vmem_bytes(tb, n, d, j):
    """Rough per-step live-set estimate for hardest_triplet_kernel."""
    live_nn = 18 * tb * n * n                              # ~4.5 live f32 (tb,n,n) tensors
    live_jn = 16 * tb * j * n                              # label casts + lw/lc
    io = 2 * (4 * tb * n * d + tb * j * n + 8 * tb * j)    # double-buffered in/out DMAs
    return live_nn + live_jn + io


def _pick_block_b(batch, n, d, j, vmem_budget, n_cores):
    """Largest batch tile that fits the VMEM budget; dual-TC chips keep >=2 steps/TC."""
    min_steps = min(batch, 2 * n_cores) if n_cores >= 2 else 1
    best = 1
    for cand in range(1, batch + 1):
        if batch % cand != 0:
            continue
        if batch // cand < min_steps:
            continue
        if _estimate_vmem_bytes(cand, n, d, j) > vmem_budget:
            continue
        best = cand
    return best


@functools.partial(jax.jit, static_argnums=(2, 3, 4, 5))
def _hardest_triplet_pallas(features, labels_i8, mp, mn, block_b, vmem_limit_bytes):
    B, N, D = features.shape
    J = labels_i8.shape[1]
    grid_b = B // block_b

    kernel = functools.partial(hardest_triplet_kernel, mp=mp, mn=mn)
    out = pl.pallas_call(
        kernel,
        out_shape=jax.ShapeDtypeStruct((B, 2, J), jnp.float32),
        grid_spec=pltpu.PrefetchScalarGridSpec(
            num_scalar_prefetch=0,
            grid=(grid_b,),
            in_specs=[pl.BlockSpec((block_b, N, D), lambda i: (i, 0, 0)),
                      pl.BlockSpec((block_b, J, N), lambda i: (i, 0, 0))],
            out_specs=pl.BlockSpec((block_b, 2, J), lambda i: (i, 0, 0))),
        compiler_params=pltpu.CompilerParams(
            dimension_semantics=("parallel",),
            vmem_limit_bytes=vmem_limit_bytes),
    )(features, labels_i8)

    lp = out[:, 0, :]
    ln = out[:, 1, :]
    # NOTE: lp/ln may contain NaN for a valid instance whose selection is empty
    # (torch's mean-of-empty); the >0 masks below drop those entries, exactly like
    # the reference's boolean indexing does.
    mask_p = lp > 0
    mask_n = ln > 0
    loss = (jnp.sum(jnp.where(mask_p, lp, 0.0)) / jnp.sum(mask_p.astype(jnp.float32))
            + jnp.sum(jnp.where(mask_n, ln, 0.0)) / jnp.sum(mask_n.astype(jnp.float32)))
    return loss, lp, ln


def hardest_triplet_loss(features, labels, mp=0.1, mn=1.0, block_b=None):
    """features: (B, N, D) f32, labels: (B, J, N) bool. Returns (loss, loss_p, loss_n)."""
    B, N, D = features.shape
    J = labels.shape[1]

    vmem_cap, n_cores = _tpu_generation_info()
    if block_b is None:
        block_b = _pick_block_b(B, N, D, J, int(0.75 * vmem_cap), n_cores)
    if B % block_b != 0:
        raise ValueError(f"block_b={block_b} must divide batch={B}")

    est = _estimate_vmem_bytes(block_b, N, D, J)
    vmem_limit = int(min(0.9 * vmem_cap, max(32 * _MIB, 2 * est)))

    # TODO(synk): for very large N (where even a single (1, N, N) distance tile blows
    # the VMEM budget, e.g. N >= ~2048 on v7x), add an anchor-row grid axis with
    # (TB, TN, N) distance stripes and accumulate lp/ln across stripes in scratch.

    labels_i8 = labels.astype(jnp.int8)   # 1 byte/point; 0/1 view restored in-kernel
    return _hardest_triplet_pallas(features, labels_i8, float(mp), float(mn),
                                   int(block_b), vmem_limit)


def reference_loss(features, labels, mp=0.1, mn=1.0):
    """Direct numpy transcription of the PyTorch forward (for verification)."""
    features = np.asarray(features, np.float32)
    labels = np.asarray(labels)
    B, N, D = features.shape
    J = labels.shape[1]
    loss_p = np.zeros((B, J), np.float32)
    loss_n = np.zeros((B, J), np.float32)
    for i in range(B):
        for j in range(J):
            m = labels[i, j]
            if m.sum() < 10:
                continue
            ftp = features[i][m]
            ftn = features[i][~m]
            pos = np.sqrt(((ftp[:, None, :] - ftp[None, :, :]) ** 2).sum(-1) + 1e-7)
            neg = np.sqrt(((ftp[:, None, :] - ftn[None, :, :]) ** 2).sum(-1) + 1e-7)
            nh = neg.min(-1)
            mpos = pos > mp
            mneg = nh < mn
            loss_p[i, j] = np.mean(np.maximum(pos[mpos] - mp, 0.0) ** 2)
            loss_n[i, j] = np.mean(np.maximum(mn - nh[mneg], 0.0) ** 2)
    loss = loss_p[loss_p > 0].mean() + loss_n[loss_n > 0].mean()
    return np.float32(loss), loss_p, loss_n


if __name__ == "__main__":
    B, J, N, D = 2, 4, 64, 32           # batch, num_instance, num_points, feat_dim

    key = jax.random.PRNGKey(0)
    k1, k2 = jax.random.split(key)

    # Clustered synthetic "normed corr features" so that all masks are non-trivial:
    # within-instance distances > mp and hardest-negative distances < mn.
    centers = jax.random.normal(k1, (J, D), jnp.float32)
    centers = 0.35 * centers / jnp.linalg.norm(centers, axis=-1, keepdims=True)
    cluster = jnp.arange(N) // (N // J)                       # 16 points per instance (>= 10)
    noise = 0.05 * jax.random.normal(k2, (B, N, D), jnp.float32)
    features = centers[cluster][None, :, :] + noise           # (B, N, D)

    labels = (cluster[None, None, :] == jnp.arange(J)[None, :, None])
    labels = jnp.broadcast_to(labels, (B, J, N))              # (B, J, N) bool

    loss, lp, ln = hardest_triplet_loss(features, labels)
    loss = jax.block_until_ready(loss)

    ref_loss, ref_lp, ref_ln = reference_loss(features, labels)
    np.testing.assert_allclose(np.asarray(lp), ref_lp, rtol=1e-3, atol=1e-5)
    np.testing.assert_allclose(np.asarray(ln), ref_ln, rtol=1e-3, atol=1e-5)
    np.testing.assert_allclose(np.asarray(loss), ref_loss, rtol=1e-3, atol=1e-5)

    print("KERNEL_OK")
</pallas_src>

<mosaic_0001>
module attributes {stable_mosaic.version = 11 : i64} {
  func.func @hardest_triplet_kernel(%arg0: i32, %arg1: memref<2x64x32xf32, #tpu.memory_space<vmem>>, %arg2: memref<2x4x64xi8, #tpu.memory_space<vmem>>, %arg3: memref<2x2x4xf32, #tpu.memory_space<vmem>>) attributes {dimension_semantics = [#tpu.dimension_semantics<parallel>], iteration_bounds = array<i64: 1>, scalar_prefetch = 0 : i64, scratch_operands = 0 : i64, tpu.core_type = #tpu.core_type<tc>, window_params = [{transform_indices = @transform_0, window_bounds = array<i64: 2, 64, 32>}, {transform_indices = @transform_1, window_bounds = array<i64: 2, 4, 64>}, {transform_indices = @transform_2, window_bounds = array<i64: 2, 2, 4>}]} {
    %c0 = arith.constant 0 : index
    %c0_0 = arith.constant 0 : index
    %c0_1 = arith.constant 0 : index
    %0 = vector.load %arg1[%c0, %c0_0, %c0_1] : memref<2x64x32xf32, #tpu.memory_space<vmem>>, vector<2x64x32xf32>
    "tpu.trace_start"() <{level = 10 : i32, message = "bnd,bmd->bnm"}> : () -> ()
    %cst = arith.constant dense<0.000000e+00> : vector<2x64x64xf32>
    %1 = tpu.matmul %0, %0, %cst {dimension_numbers = #tpu.dot_dimension_numbers<[2], [2], [1], [1], [0, 0, 0, 1, 1, 1], [0], [0]>, precision = #tpu.contract_precision<fp32>} : vector<2x64x32xf32>, vector<2x64x32xf32>, vector<2x64x64xf32> -> vector<2x64x64xf32>
    "tpu.trace_stop"() : () -> ()
    %2 = arith.mulf %0, %0 : vector<2x64x32xf32>
    %cst_2 = arith.constant dense<0.000000e+00> : vector<2x64xf32>
    %3 = vector.multi_reduction <add>, %2, %cst_2 [2] : vector<2x64x32xf32> to vector<2x64xf32>
    %4 = vector.shape_cast %3 : vector<2x64xf32> to vector<2x64x1xf32>
    %5 = vector.shape_cast %3 : vector<2x64xf32> to vector<2x1x64xf32>
    %6 = vector.broadcast %4 : vector<2x64x1xf32> to vector<2x64x64xf32>
    %7 = vector.broadcast %5 : vector<2x1x64xf32> to vector<2x64x64xf32>
    %8 = arith.addf %6, %7 : vector<2x64x64xf32>
    %cst_3 = arith.constant 2.000000e+00 : f32
    %9 = vector.broadcast %cst_3 : f32 to vector<2x64x64xf32>
    %10 = arith.mulf %9, %1 : vector<2x64x64xf32>
    %11 = arith.subf %8, %10 : vector<2x64x64xf32>
    %cst_4 = arith.constant 0.000000e+00 : f32
    %12 = vector.broadcast %cst_4 : f32 to vector<2x64x64xf32>
    %13 = arith.maximumf %11, %12 : vector<2x64x64xf32>
    %cst_5 = arith.constant 1.000000e-07 : f32
    %14 = vector.broadcast %cst_5 : f32 to vector<2x64x64xf32>
    %15 = arith.addf %13, %14 : vector<2x64x64xf32>
    %16 = math.sqrt %15 : vector<2x64x64xf32>
    %c0_6 = arith.constant 0 : index
    %c0_7 = arith.constant 0 : index
    %c0_8 = arith.constant 0 : index
    %17 = vector.load %arg2[%c0_6, %c0_7, %c0_8] : memref<2x4x64xi8, #tpu.memory_space<vmem>>, vector<2x4x64xi8>
    %18 = arith.sitofp %17 : vector<2x4x64xi8> to vector<2x4x64xf32>
    %cst_9 = arith.constant 1.000000e-01 : f32
    %19 = vector.broadcast %cst_9 : f32 to vector<2x64x64xf32>
    %20 = arith.subf %16, %19 : vector<2x64x64xf32>
    %cst_10 = arith.constant 0.000000e+00 : f32
    %21 = vector.broadcast %cst_10 : f32 to vector<2x64x64xf32>
    %22 = arith.maximumf %20, %21 : vector<2x64x64xf32>
    %23 = arith.mulf %22, %22 : vector<2x64x64xf32>
    %cst_11 = arith.constant 1.000000e-01 : f32
    %24 = vector.broadcast %cst_11 : f32 to vector<2x64x64xf32>
    %25 = arith.cmpf ogt, %16, %24 : vector<2x64x64xf32>
    %26 = arith.extui %25 : vector<2x64x64xi1> to vector<2x64x64xi32>
    %27 = arith.sitofp %26 : vector<2x64x64xi32> to vector<2x64x64xf32>
    %28 = arith.truncf %27 : vector<2x64x64xf32> to vector<2x64x64xbf16>
    "tpu.trace_start"() <{level = 10 : i32, message = "bjn,bnm->bjm"}> : () -> ()
    %cst_12 = arith.constant dense<0.000000e+00> : vector<2x4x64xf32>
    %29 = tpu.matmul %18, %23, %cst_12 {dimension_numbers = #tpu.dot_dimension_numbers<[2], [1], [1], [2], [0, 0, 0, 1, 1, 2], [0], [0]>, precision = #tpu.contract_precision<fp32>} : vector<2x4x64xf32>, vector<2x64x64xf32>, vector<2x4x64xf32> -> vector<2x4x64xf32>
    "tpu.trace_stop"() : () -> ()
    %30 = arith.sitofp %17 : vector<2x4x64xi8> to vector<2x4x64xbf16>
    "tpu.trace_start"() <{level = 10 : i32, message = "bjn,bnm->bjm"}> : () -> ()
    %cst_13 = arith.constant dense<0.000000e+00> : vector<2x4x64xf32>
    %31 = tpu.matmul %30, %28, %cst_13 {dimension_numbers = #tpu.dot_dimension_numbers<[2], [1], [1], [2], [0, 0, 0, 1, 1, 2], [0], [0]>} : vector<2x4x64xbf16>, vector<2x64x64xbf16>, vector<2x4x64xf32> -> vector<2x4x64xf32>
    "tpu.trace_stop"() : () -> ()
    %32 = arith.mulf %29, %18 : vector<2x4x64xf32>
    %cst_14 = arith.constant dense<0.000000e+00> : vector<2x4xf32>
    %33 = vector.multi_reduction <add>, %32, %cst_14 [2] : vector<2x4x64xf32> to vector<2x4xf32>
    %34 = arith.mulf %31, %18 : vector<2x4x64xf32>
    %cst_15 = arith.constant dense<0.000000e+00> : vector<2x4xf32>
    %35 = vector.multi_reduction <add>, %34, %cst_15 [2] : vector<2x4x64xf32> to vector<2x4xf32>
    %36 = tpu.iota {dimensions = array<i32: 1>} : vector<1x4x1xi32>
    %37 = tpu.iota {dimensions = array<i32: 1>} : vector<1x4xi32>
    %cst_16 = arith.constant 0.000000e+00 : f32
    %38 = vector.broadcast %cst_16 : f32 to vector<2x4xf32>
    %cst_17 = arith.constant 1.000000e+30 : f32
    %c0_i32 = arith.constant 0 : i32
    %c4_i32 = arith.constant 4 : i32
    %39 = arith.addi %c0_i32, %c4_i32 : i32
    %c1_i32 = arith.constant 1 : i32
    %40:2 = scf.for %arg4 = %c0_i32 to %39 step %c1_i32 iter_args(%arg5 = %38, %arg6 = %38) -> (vector<2x4xf32>, vector<2x4xf32>)  : i32 {
      %53 = vector.broadcast %arg4 : i32 to vector<1x4x1xi32>
      %54 = arith.cmpi eq, %36, %53 : vector<1x4x1xi32>
      %cst_25 = arith.constant 0.000000e+00 : f32
      %55 = vector.shape_cast %54 : vector<1x4x1xi1> to vector<1x4x1xi1>
      %56 = vector.broadcast %55 : vector<1x4x1xi1> to vector<2x4x64xi1>
      %57 = vector.broadcast %cst_25 : f32 to vector<2x4x64xf32>
      %58 = arith.select %56, %18, %57 : vector<2x4x64xi1>, vector<2x4x64xf32>
      %cst_26 = arith.constant dense<0xFF800000> : vector<2x64xf32>
      %59 = vector.multi_reduction <maximumf>, %58, %cst_26 [1] : vector<2x4x64xf32> to vector<2x64xf32>
      %cst_27 = arith.constant 5.000000e-01 : f32
      %60 = vector.broadcast %cst_27 : f32 to vector<2x64xf32>
      %61 = arith.cmpf ogt, %59, %60 : vector<2x64xf32>
      %62 = vector.shape_cast %61 : vector<2x64xi1> to vector<2x1x64xi1>
      %63 = vector.shape_cast %62 : vector<2x1x64xi1> to vector<2x1x64xi1>
      %64 = vector.broadcast %63 : vector<2x1x64xi1> to vector<2x64x64xi1>
      %65 = vector.broadcast %cst_17 : f32 to vector<2x64x64xf32>
      %66 = arith.select %64, %65, %16 : vector<2x64x64xi1>, vector<2x64x64xf32>
      %cst_28 = arith.constant dense<0x7F800000> : vector<2x64xf32>
      %67 = vector.multi_reduction <minimumf>, %66, %cst_28 [2] : vector<2x64x64xf32> to vector<2x64xf32>
      %cst_29 = arith.constant 1.000000e+00 : f32
      %68 = vector.broadcast %cst_29 : f32 to vector<2x64xf32>
      %69 = arith.cmpf olt, %67, %68 : vector<2x64xf32>
      %70 = arith.andi %61, %69 : vector<2x64xi1>
      %cst_30 = arith.constant 1.000000e+00 : f32
      %71 = vector.broadcast %cst_30 : f32 to vector<2x64xf32>
      %72 = arith.subf %71, %67 : vector<2x64xf32>
      %cst_31 = arith.constant 0.000000e+00 : f32
      %73 = vector.broadcast %cst_31 : f32 to vector<2x64xf32>
      %74 = arith.select %70, %72, %73 : vector<2x64xi1>, vector<2x64xf32>
      %75 = arith.mulf %74, %74 : vector<2x64xf32>
      %cst_32 = arith.constant dense<0.000000e+00> : vector<2xf32>
      %76 = vector.multi_reduction <add>, %75, %cst_32 [1] : vector<2x64xf32> to vector<2xf32>
      %77 = vector.shape_cast %76 : vector<2xf32> to vector<2x1xf32>
      %78 = arith.extui %70 : vector<2x64xi1> to vector<2x64xi32>
      %79 = arith.sitofp %78 : vector<2x64xi32> to vector<2x64xf32>
      %cst_33 = arith.constant dense<0.000000e+00> : vector<2xf32>
      %80 = vector.multi_reduction <add>, %79, %cst_33 [1] : vector<2x64xf32> to vector<2xf32>
      %81 = vector.shape_cast %80 : vector<2xf32> to vector<2x1xf32>
      %82 = vector.broadcast %arg4 : i32 to vector<1x4xi32>
      %83 = arith.cmpi eq, %37, %82 : vector<1x4xi32>
      %84 = vector.shape_cast %83 : vector<1x4xi1> to vector<1x4xi1>
      %85 = vector.broadcast %84 : vector<1x4xi1> to vector<2x4xi1>
      %86 = vector.shape_cast %77 : vector<2x1xf32> to vector<2x1xf32>
      %87 = vector.broadcast %86 : vector<2x1xf32> to vector<2x4xf32>
      %88 = arith.select %85, %87, %arg5 : vector<2x4xi1>, vector<2x4xf32>
      %89 = vector.shape_cast %83 : vector<1x4xi1> to vector<1x4xi1>
      %90 = vector.broadcast %89 : vector<1x4xi1> to vector<2x4xi1>
      %91 = vector.shape_cast %81 : vector<2x1xf32> to vector<2x1xf32>
      %92 = vector.broadcast %91 : vector<2x1xf32> to vector<2x4xf32>
      %93 = arith.select %90, %92, %arg6 : vector<2x4xi1>, vector<2x4xf32>
      scf.yield %88, %93 : vector<2x4xf32>, vector<2x4xf32>
    }
    %c4_i32_18 = arith.constant 4 : i32
    %cst_19 = arith.constant dense<0.000000e+00> : vector<2x4xf32>
    %41 = vector.multi_reduction <add>, %18, %cst_19 [2] : vector<2x4x64xf32> to vector<2x4xf32>
    %cst_20 = arith.constant 1.000000e+01 : f32
    %42 = vector.broadcast %cst_20 : f32 to vector<2x4xf32>
    %43 = arith.cmpf oge, %41, %42 : vector<2x4xf32>
    %cst_21 = arith.constant 0.000000e+00 : f32
    %44 = vector.broadcast %cst_21 : f32 to vector<2x4xf32>
    %45 = arith.divf %33, %35 : vector<2x4xf32>
    %46 = arith.select %43, %45, %44 : vector<2x4xi1>, vector<2x4xf32>
    %47 = arith.divf %40#0, %40#1 : vector<2x4xf32>
    %48 = arith.select %43, %47, %44 : vector<2x4xi1>, vector<2x4xf32>
    %49 = vector.shape_cast %46 : vector<2x4xf32> to vector<2x1x4xf32>
    %50 = vector.shape_cast %48 : vector<2x4xf32> to vector<2x1x4xf32>
    %51 = tpu.concatenate %49, %50 in 1 : vector<2x1x4xf32>, vector<2x1x4xf32> -> vector<2x2x4xf32>
    %c0_22 = arith.constant 0 : index
    %c0_23 = arith.constant 0 : index
    %c0_24 = arith.constant 0 : index
    %52 = vector.load %arg3[%c0_22, %c0_23, %c0_24] : memref<2x2x4xf32, #tpu.memory_space<vmem>>, vector<2x2x4xf32>
    tpu.vector_store %arg3[%c0_22, %c0_23, %c0_24], %51 {strides = array<i32>} : memref<2x2x4xf32, #tpu.memory_space<vmem>>, vector<2x2x4xf32>,
    return
  }
  func.func @transform_0(%arg0: i32) -> (i32, i32, i32) {
    %c0_i32 = arith.constant 0 : i32
    %c0_i32_0 = arith.constant 0 : i32
    %c0_i32_1 = arith.constant 0 : i32
    return %arg0, %c0_i32, %c0_i32_0 : i32, i32, i32
  }
  func.func @transform_1(%arg0: i32) -> (i32, i32, i32) {
    %c0_i32 = arith.constant 0 : i32
    %c0_i32_0 = arith.constant 0 : i32
    %c0_i32_1 = arith.constant 0 : i32
    return %arg0, %c0_i32, %c0_i32_0 : i32, i32, i32
  }
  func.func @transform_2(%arg0: i32) -> (i32, i32, i32) {
    %c0_i32 = arith.constant 0 : i32
    %c0_i32_0 = arith.constant 0 : i32
    %c0_i32_1 = arith.constant 0 : i32
    return %arg0, %c0_i32, %c0_i32_0 : i32, i32, i32
  }
}

</mosaic_0001>

<bundles_post_ra>
// kernel: _hardest_triplet_pallas.1
= control target key start
LH: loop header
LB: loop body
LE: loop exit
PB: predicated region body
PF: predicated region fallthrough
CT: control target
= control target key end

     0   :  { %vm28_vm0 = vcmask 261120   ;;  %vm5362_vm2 = vmmov 0   ;;  %vm7001_vm3 = vcmask 130112   ;;  %vm7000_vm4 = vcmask 195712   ;;  %s6894_s0 = inlined_call_operand.vmem [shape: f32[2,64,32], index: 0, kind: input, shape index: {}]   ;;  %s6895_s2 = inlined_call_operand.vmem [shape: f32[2,2,4], index: 2, kind: output, shape index: {}]   ;;  %s6896_s1 = inlined_call_operand.vmem [shape: s8[2,4,64], index: 1, kind: input, shape index: {}]  }
   0x1   :  { %v5386_v0 = vld [vmem:[%s6894_s0] sm:$0xff]  ;;  %v5391_v1 = vld [vmem:[%s6894_s0 + $0x8] sm:$0xff]  ;;  %v5412_v7 = vld [vmem:[%s6894_s0 + $0x10] sm:$0xff]  ;;  %vm6999_vm5 = vcmask 261312   ;;  %vm2250_vm6 = vcmask 523264   ;;  %vm6998_vm7 = vcmask 326912  }
   0x2   :  { %v5396_v2 = vld [vmem:[%s6894_s0 + $0x40] sm:$0xff]  ;;  %v30_v3 = vsel %vm28_vm0, %v5386_v0, 0  ;;  %v33_v4 = vsel %vm28_vm0, %v5391_v1, 0  ;;  %v5405_v5 = vld [vmem:[%s6894_s0 + $0x48] sm:$0xff]  ;;  %v5417_v8 = vld [vmem:[%s6894_s0 + $0x18] sm:$0xff]  ;;  %v36_v16 = vsel %vm28_vm0, %v5412_v7, 0 }
   0x3   :  { %v892_v6 = vsel %vm28_vm0, %v5396_v2, 0  ;;  %v5419_v9 = vand.u32 4294901760, %v30_v3  ;;  %v5421_v10 = vand.u32 4294901760, %v33_v4  ;;  %v895_v11 = vsel %vm28_vm0, %v5405_v5, 0  ;;  %v5430_v13 = vld [vmem:[%s6894_s0 + $0x50] sm:$0xff]  ;;  %v5435_v14 = vld [vmem:[%s6894_s0 + $0x58] sm:$0xff] }
   0x4   :  { %v5425_v12 = vand.u32 4294901760, %v892_v6  ;;  %v5437_v15 = vand.u32 4294901760, %v895_v11  ;;  %v39_v17 = vsel %vm28_vm0, %v5417_v8, 0  ;;  %v5445_v18 = vsel %vm28_vm0, %v5430_v13, 0  ;;  %v5450_v19 = vld [vmem:[%s6894_s0 + $0x20] sm:$0xff]  ;;  %v5455_v20 = vld [vmem:[%s6894_s0 + $0x28] sm:$0xff] }
   0x5   :  { %7002 = vst [vmem:[#allocation2_spill] sm:$0xff] %v5455_v20  ;;  %v5459_v21 = vpack.c.bf16 %v5421_v10, %v5419_v9  ;;  %v5461_v22 = vand.u32 4294901760, %v36_v16  ;;  %v5463_v23 = vand.u32 4294901760, %v39_v17  ;;  %v901_v24 = vsel %vm28_vm0, %v5435_v14, 0  ;;  %v5470_v25 = vld [vmem:[%s6894_s0 + $0x60] sm:$0xff]  ;;  %v5475_v26 = vld [vmem:[%s6894_s0 + $0x68] sm:$0xff] }
   0x6   :  { %7003 = vst [vmem:[#allocation3_spill] sm:$0xff] %v5475_v26  ;;  %v5479_v27 = vpack.c.bf16 %v5437_v15, %v5425_v12  ;;  %v5482_v28 = vand.u32 4294901760, %v5445_v18  ;;  %v5484_v29 = vand.u32 4294901760, %v901_v24  ;;  %v5488_v30 = vsel %vm28_vm0, %v5450_v19, 0  ;;  %v5531_v40 = vld [vmem:[%s6894_s0 + $0x30] sm:$0xff]  ;;  %v5536_v41 = vld [vmem:[%s6894_s0 + $0x38] sm:$0xff] }
   0x7   :  { %4829 = vmatprep.subr.bf16.mxu0 %v5459_v21  ;;  %v5493_v31 = vpack.c.bf16 %v5463_v23, %v5461_v22  ;;  %v5497_v32 = vsel %vm28_vm0, %v5455_v20, 0  ;;  %v5501_v33 = vsel %vm28_vm0, %v5470_v25, 0  ;;  %v5511_v35 = vsel %vm28_vm0, %v5475_v26, 0  ;;  %7007 = vst [vmem:[#allocation7_spill] sm:$0xff] %v5531_v40  ;;  %7008 = vst [vmem:[#allocation8_spill] sm:$0xff] %v5536_v41  ;;  %v5544_v43 = vld [vmem:[%s6894_s0 + $0x70] sm:$0xff] }
   0x8   :  { %7004 = vst [vmem:[#allocation4_spill] sm:$0xff] %v5479_v27  ;;  %4925 = vmatprep.subr.bf16.mxu1 %v5479_v27  ;;  %4831 = vmatpush3.bf16.xpose.msra.mxu0 %v5459_v21  ;;  %v5507_v34 = vpack.c.bf16 %v5484_v29, %v5482_v28  ;;  %v5516_v36 = vand.u32 4294901760, %v5488_v30  ;;  %v5519_v37 = vand.u32 4294901760, %v5497_v32  ;;  %v5523_v38 = vand.u32 4294901760, %v5501_v33  ;;  %7009 = vst [vmem:[#allocation9_spill] sm:$0xff] %v5544_v43  ;;  %v5549_v44 = vld [vmem:[%s6894_s0 + $0x78] sm:$0xff] }
   0x9   :  { %7005 = vst [vmem:[#allocation5_spill] sm:$0xff] %v5493_v31  ;;  %4927 = vmatpush3.bf16.xpose.msra.mxu1 %v5479_v27  ;;  %4833 = vmatprep.subr.bf16.mxu0 %v5493_v31  ;;  %v5526_v39 = vand.u32 4294901760, %v5511_v35  ;;  %v5539_v42 = vsub.f32 %v30_v3, %v5419_v9  ;;  %7010 = vst [vmem:[#allocation10_spill] sm:$0xff] %v5549_v44  ;;  %v5552_v45 = vsub.f32 %v892_v6, %v5425_v12  ;;  %vm6997_vm8 = vcmask 392512  }
   0xa   :  { %7006 = vst [vmem:[#allocation6_spill] sm:$0xff] %v5507_v34  ;;  %4929 = vmatprep.subr.bf16.mxu1 %v5507_v34  ;;  %v5556_v46 = vpack.c.bf16 %v5519_v37, %v5516_v36  ;;  %v5560_v47 = vsel %vm28_vm0, %v5531_v40, 0  ;;  %v5566_v49 = vsub.f32 %v33_v4, %v5421_v10  ;;  %v5574_v51 = vsel %vm28_vm0, %v5536_v41, 0 }
   0xb   :  { %v5563_v48 = vand.u32 4294901760, %v5539_v42  ;;  %v5570_v50 = vpack.c.bf16 %v5526_v39, %v5523_v38  ;;  %v5577_v52 = vand.u32 4294901760, %v5552_v45  ;;  %v5580_v53 = vsub.f32 %v895_v11, %v5437_v15 }
   0xc   :  { %7011 = vst [vmem:[#allocation11_spill] sm:$0xff] %v5556_v46  ;;  %v5584_v54 = vsel %vm28_vm0, %v5544_v43, 0  ;;  %v5588_v55 = vsel %vm28_vm0, %v5549_v44, 0  ;;  %v5598_v58 = vand.u32 4294901760, %v5560_v47  ;;  %v5601_v59 = vand.u32 4294901760, %v5574_v51 }
   0xd   :  { %7012 = vst [vmem:[#allocation12_spill] sm:$0xff] %v5563_v48  ;;  %7013 = vst [vmem:[#allocation13_spill] sm:$0xff] %v5570_v50  ;;  %v129_v56 = vsub.f32 %v5539_v42, %v5563_v48  ;;  %v991_v57 = vsub.f32 %v5552_v45, %v5577_v52  ;;  %v5604_v61 = vand.u32 4294901760, %v5566_v49  ;;  %v5608_v62 = vand.u32 4294901760, %v5584_v54 }
   0xe   :  { %7014 = vst [vmem:[#allocation14_spill] sm:$0xff] %v5577_v52  ;;  %v5611_v63 = vand.u32 4294901760, %v5588_v55  ;;  %v5614_v4 = vand.u32 4294901760, %v5580_v53  ;;  %v5617_v6 = vsub.f32 %v36_v16, %v5461_v22  ;;  %v5620_v11 = vsub.f32 %v39_v17, %v5463_v23 }
   0xf   :  { %v130_v60 = vand.u32 4294901760, %v129_v56  ;;  %7015 = vst [vmem:[#allocation15_spill] sm:$0xff] %v5604_v61  ;;  %v992_v3 = vand.u32 4294901760, %v991_v57  ;;  %v5624_v56 = vpack.c.bf16 %v5601_v59, %v5598_v58  ;;  %v139_v52 = vsub.f32 %v5566_v49, %v5604_v61 }
  0x10   :  { %4835 = vmatpush3.bf16.xpose.msra.mxu0 %v5493_v31  ;;  %7016 = vst [vmem:[#allocation16_spill] sm:$0xff] %v5614_v4  ;;  %v5630_v57 = vsub.f32 %v5445_v18, %v5482_v28  ;;  %v5634_v41 = vpack.c.bf16 %v5611_v63, %v5608_v62  ;;  %v1001_v16 = vsub.f32 %v5580_v53, %v5614_v4  ;;  %v5643_v48 = vand.u32 4294901760, %v5617_v6 }
  0x11   :  { %4931 = vmatpush3.bf16.xpose.msra.mxu1 %v5507_v34  ;;  %4837 = vmatprep.subr.bf16.mxu0 %v5556_v46  ;;  %7017 = vst [vmem:[#allocation17_spill] sm:$0xff] %v5624_v56  ;;  %v5639_v17 = vsub.f32 %v901_v24, %v5484_v29  ;;  %v5646_v61 = vand.u32 4294901760, %v5620_v11  ;;  %v140_v18 = vand.u32 4294901760, %v139_v52  ;;  %v5665_v52 = vsub.f32 %v5488_v30, %v5516_v36 }
  0x12   :  { %4933 = vmatprep.subr.bf16.mxu1 %v5570_v50  ;;  %4256 = vmatprep.mubr.f32.mxu0 %v130_v60  ;;  %7018 = vst [vmem:[#allocation18_spill] sm:$0xff] %v5634_v41  ;;  %7019 = vst [vmem:[#allocation19_spill] sm:$0xff] %v5643_v48  ;;  %v5651_v44 = vand.u32 4294901760, %v5630_v57  ;;  %v1002_v24 = vand.u32 4294901760, %v1001_v16  ;;  %v5669_v16 = vsub.f32 %v5497_v32, %v5519_v37  ;;  %vm6996_vm9 = vcmask 458112  }
  0x13   :  { %4424 = vmatprep.mubr.f32.mxu1 %v992_v3  ;;  %7020 = vst [vmem:[#allocation20_spill] sm:$0xff] %v5646_v61  ;;  %v5655_v4 = vand.u32 4294901760, %v5639_v17  ;;  %v159_v40 = vsub.f32 %v5620_v11, %v5646_v61  ;;  %v4844_v43 = vpack.c.bf16 %v140_v18, %v130_v60  ;;  %v5679_v60 = vsub.f32 %v5511_v35, %v5526_v39 }
  0x14   :  { %7021 = vst [vmem:[#allocation21_spill] sm:$0xff] %v5651_v44  ;;  %v4940_v34 = vpack.c.bf16 %v1002_v24, %v992_v3  ;;  %v5684_v32 = vand.u32 4294901760, %v5665_v52  ;;  %v5687_v3 = vand.u32 4294901760, %v5669_v16  ;;  %vm6995_vm10 = vcmask 523712  }
  0x15   :  { %7022 = vst [vmem:[#allocation22_spill] sm:$0xff] %v5655_v4  ;;  %v1021_v31 = vsub.f32 %v5639_v17, %v5655_v4  ;;  %v5693_v35 = vand.u32 4294901760, %v5679_v60 }
  0x16   :  { %7023 = vst [vmem:[#allocation23_spill] sm:$0xff] %v5684_v32  ;;  %7024 = vst [vmem:[#allocation24_spill] sm:$0xff] %v5687_v3 }
  0x17   :  { %v1022_v4 = vand.u32 4294901760, %v1021_v31  ;;  %7026 = vst [vmem:[#allocation26_spill] sm:$0xff] %v5693_v35  ;;  %v5705_v31 = vsub.f32 %v5574_v51, %v5601_v59 }
  0x18   :  { %4839 = vmatpush3.bf16.xpose.msra.mxu0 %v5556_v46  ;;  %v149_v46 = vsub.f32 %v5617_v6, %v5643_v48  ;;  %v5675_v48 = vsub.f32 %v5501_v33, %v5523_v38 }
  0x19   :  { %4935 = vmatpush3.bf16.xpose.msra.mxu1 %v5570_v50  ;;  %4841 = vmatprep.subr.bf16.mxu0 %v5624_v56  ;;  %v1011_v50 = vsub.f32 %v5630_v57, %v5651_v44  ;;  %v160_v44 = vand.u32 4294901760, %v159_v40  ;;  %v5697_v40 = vsub.f32 %v5560_v47, %v5598_v58  ;;  %v1041_v47 = vsub.f32 %v5679_v60, %v5693_v35 }
  0x1a   :  { %4937 = vmatprep.subr.bf16.mxu1 %v5634_v41  ;;  %v150_v30 = vand.u32 4294901760, %v149_v46  ;;  %v5690_v61 = vand.u32 4294901760, %v5675_v48  ;;  %v5723_v27 = vand.u32 4294901760, %v5705_v31 }
  0x1b   :  { %v1012_v33 = vand.u32 4294901760, %v1011_v50  ;;  %v5709_v50 = vsub.f32 %v5584_v54, %v5608_v62  ;;  %v5720_v51 = vand.u32 4294901760, %v5697_v40 }
  0x1c   :  { %7025 = vst [vmem:[#allocation25_spill] sm:$0xff] %v5690_v61  ;;  %v4848_v46 = vpack.c.bf16 %v160_v44, %v150_v30  ;;  %v1031_v26 = vsub.f32 %v5675_v48, %v5690_v61 }
  0x1d   :  { %v4944_v20 = vpack.c.bf16 %v1022_v4, %v1012_v33  ;;  %v5726_v61 = vand.u32 4294901760, %v5709_v50 }
  0x1e   :  { %v1032_v35 = vand.u32 4294901760, %v1031_v26 }
  0x1f   :  { %v1051_v26 = vsub.f32 %v5709_v50, %v5726_v61 }
  0x20   :  { %4843 = vmatpush3.bf16.xpose.msra.mxu0 %v5624_v56  ;;  %v179_v56 = vsub.f32 %v5669_v16, %v5687_v3 }
  0x21   :  { %4939 = vmatpush3.bf16.xpose.msra.mxu1 %v5634_v41  ;;  %4845 = vmatprep.subr.bf16.mxu0 %v4844_v43  ;;  %v169_v41 = vsub.f32 %v5665_v52, %v5684_v32  ;;  %v5717_v32 = vsub.f32 %v5588_v55, %v5611_v63  ;;  %v1042_v55 = vand.u32 4294901760, %v1041_v47 }
  0x22   :  { %4941 = vmatprep.subr.bf16.mxu1 %v4940_v34  ;;  %v180_v3 = vand.u32 4294901760, %v179_v56  ;;  %v199_v56 = vsub.f32 %v5705_v31, %v5723_v27 }
  0x23   :  { %v170_v54 = vand.u32 4294901760, %v169_v41 }
  0x25   :  { %v4852_v41 = vpack.c.bf16 %v180_v3, %v170_v54 }
  0x27   :  { %4257 = vmatmul.mubr.f32.vlgmr.msra.gmra.mrb[0].mxu0 %v140_v18  ;;  %v4948_v18 = vpack.c.bf16 %v1042_v55, %v1032_v35 }
  0x28   :  { %4847 = vmatpush3.bf16.xpose.msra.mxu0 %v4844_v43  ;;  %4425 = vmatmul.mubr.f32.vlgmr.msra.gmra.mrb[0].mxu1 %v1002_v24  ;;  %v5729_v43 = vand.u32 4294901760, %v5717_v32 }
  0x29   :  { %4943 = vmatpush3.bf16.xpose.msra.mxu1 %v4940_v34  ;;  %4849 = vmatprep.subr.bf16.mxu0 %v4848_v46  ;;  %v189_v34 = vsub.f32 %v5697_v40, %v5720_v51 }
  0x2a   :  { %4945 = vmatprep.subr.bf16.mxu1 %v4944_v20  ;;  %4259 = vmatprep.mubr.f32.mxu0 %v150_v30  ;;  %v1061_v24 = vsub.f32 %v5717_v32, %v5729_v43  ;;  %v1052_v30 = vand.u32 4294901760, %v1051_v26 }
  0x2b   :  { %4427 = vmatprep.mubr.f32.mxu1 %v1012_v33  ;;  %4260 = vmatmul.mubr.f32.gmra.mrb[2].mxu0 %v160_v44  ;;  %v190_v44 = vand.u32 4294901760, %v189_v34  ;;  %v4964_v34 = vpack.c.bf16 %v5679_v60, %v5675_v48 }
  0x2c   :  { %4428 = vmatmul.mubr.f32.gmra.mrb[2].mxu1 %v1022_v4  ;;  %4262 = vmatprep.mubr.f32.mxu0 %v170_v54  ;;  %v200_v4 = vand.u32 4294901760, %v199_v56  ;;  %v1062_v33 = vand.u32 4294901760, %v1061_v24  ;;  %v4960_v54 = vpack.c.bf16 %v5639_v17, %v5630_v57  ;;  %v1753_v56 = vmul.f32 %v5386_v0, %v5386_v0 }
  0x2d   :  { %4430 = vmatprep.mubr.f32.mxu1 %v1032_v35  ;;  %v1754_v0 = vmul.f32 %v5391_v1, %v5391_v1  ;;  %v4872_v24 = vpack.c.bf16 %v5705_v31, %v5697_v40  ;;  %v1755_v1 = vmul.f32 %v5412_v7, %v5412_v7  ;;  %v1765_v7 = vmul.f32 %v5470_v25, %v5470_v25 }
  0x2e   :  { %v4856_v35 = vpack.c.bf16 %v200_v4, %v190_v44  ;;  %v4952_v47 = vpack.c.bf16 %v1062_v33, %v1052_v30 }
  0x2f   :  { %4263 = vmatmul.mubr.f32.gmra.mrb[4].mxu0 %v180_v3  ;;  %v4956_v3 = vpack.c.bf16 %v5580_v53, %v5552_v45 }
  0x30   :  { %4851 = vmatpush3.bf16.xpose.msra.mxu0 %v4848_v46  ;;  %4431 = vmatmul.mubr.f32.gmra.mrb[4].mxu1 %v1042_v55  ;;  %v4864_v46 = vpack.c.bf16 %v5620_v11, %v5617_v6  ;;  %v4868_v55 = vpack.c.bf16 %v5669_v16, %v5665_v52 }
  0x31   :  { %4947 = vmatpush3.bf16.xpose.msra.mxu1 %v4944_v20  ;;  %4853 = vmatprep.subr.bf16.mxu0 %v4852_v41  ;;  %v4860_v20 = vpack.c.bf16 %v5566_v49, %v5539_v42 }
  0x32   :  { %4949 = vmatprep.subr.bf16.mxu1 %v4948_v18  ;;  %4265 = vmatprep.mubr.f32.mxu0 %v190_v44  ;;  %v4968_v44 = vpack.c.bf16 %v5717_v32, %v5709_v50 }
  0x33   :  { %4433 = vmatprep.mubr.f32.mxu1 %v1052_v30  ;;  %4266 = vmatmul.mubr.f32.gmra.mrb[6].mxu0 %v200_v4  ;;  %v1764_v30 = vmul.f32 %v5435_v14, %v5435_v14  ;;  %v7027_v14 = vld [vmem:[#allocation4_spill] sm:$0xff] }
  0x34   :  { %4434 = vmatmul.mubr.f32.gmra.mrb[6].mxu1 %v1062_v33  ;;  %4284 = vmatprep.mubr.f32.mxu0 %v5419_v9  ;;  %v1775_v33 = vsel %vm28_vm0, %v1755_v1, 0.0  ;;  %v7045_v1 = vld [vmem:[#allocation20_spill] sm:$0xff] }
  0x35   :  { %4452 = vmatprep.mubr.f32.mxu1 %v5425_v12 }
  0x38   :  { %4855 = vmatpush3.bf16.xpose.msra.mxu0 %v4852_v41  ;;  %v1761_v41 = vmul.f32 %v5396_v2, %v5396_v2  ;;  %v1769_v2 = vsel %vm28_vm0, %v1753_v56, 0.0 }
  0x39   :  { %4951 = vmatpush3.bf16.xpose.msra.mxu1 %v4948_v18  ;;  %4857 = vmatprep.subr.bf16.mxu0 %v4856_v35  ;;  %v1762_v18 = vmul.f32 %v5405_v5, %v5405_v5  ;;  %v1763_v5 = vmul.f32 %v5430_v13, %v5430_v13  ;;  %v1756_v13 = vmul.f32 %v5417_v8, %v5417_v8  ;;  %v1805_v8 = vsel %vm28_vm0, %v1765_v7, 0.0  ;;  %v7049_v7 = vld [vmem:[#allocation24_spill] sm:$0xff] }
  0x3a   :  { %4953 = vmatprep.subr.bf16.mxu1 %v4952_v47  ;;  %v1793_v26 = vsel %vm28_vm0, %v1761_v41, 0.0  ;;  %1770 = vadd.xlane.f32.xlu0 %v1769_v2  ;;  %v7038_v2 = vld [vmem:[#allocation8_spill] sm:$0xff] }
  0x3b   :  { %1794 = vadd.xlane.f32.xlu1 %v1793_v26  ;;  %v1796_v4 = vsel %vm28_vm0, %v1762_v18, 0.0  ;;  %v1760_v18 = vmul.f32 %v7038_v2, %v7038_v2 }
  0x3f   :  { %1797 = vadd.xlane.f32.xlu1 %v1796_v4  ;;  %v7043_v4 = vld [vmem:[#allocation16_spill] sm:$0xff] }
  0x40   :  { %4859 = vmatpush3.bf16.xpose.msra.mxu0 %v4856_v35  ;;  %v1802_v35 = vsel %vm28_vm0, %v1764_v30, 0.0  ;;  %v7046_v30 = vld [vmem:[#allocation21_spill] sm:$0xff] }
  0x41   :  { %4955 = vmatpush3.bf16.xpose.msra.mxu1 %v4952_v47  ;;  %4861 = vmatprep.subr.bf16.mxu0 %v4860_v20  ;;  %v1778_v47 = vsel %vm28_vm0, %v1756_v13, 0.0 }
  0x42   :  { %4957 = vmatprep.subr.bf16.mxu1 %v4956_v3 }
  0x47   :  { %4285 = vmatmul.mubr.f32.vlgmr.msra.gmra.mrb[0].mxu0 %v5421_v10 }
  0x48   :  { %4863 = vmatpush3.bf16.xpose.msra.mxu0 %v4860_v20  ;;  %4453 = vmatmul.mubr.f32.vlgmr.msra.gmra.mrb[0].mxu1 %v5437_v15  ;;  %v1757_v20 = vmul.f32 %v5450_v19, %v5450_v19 }
  0x49   :  { %4959 = vmatpush3.bf16.xpose.msra.mxu1 %v4956_v3  ;;  %4865 = vmatprep.subr.bf16.mxu0 %v4864_v46 }
  0x4a   :  { %4961 = vmatprep.subr.bf16.mxu1 %v4960_v54  ;;  %4287 = vmatprep.mubr.f32.mxu0 %v5461_v22  ;;  %v1781_v3 = vsel %vm28_vm0, %v1757_v20, 0.0  ;;  %v7050_v20 = vld [vmem:[#allocation25_spill] sm:$0xff] }
  0x4b   :  { %4455 = vmatprep.mubr.f32.mxu1 %v5482_v28  ;;  %4288 = vmatmul.mubr.f32.gmra.mrb[2].mxu0 %v5463_v23 }
  0x4c   :  { %4456 = vmatmul.mubr.f32.gmra.mrb[2].mxu1 %v5484_v29  ;;  %4290 = vmatprep.mubr.f32.mxu0 %v5516_v36 }
  0x4d   :  { %4458 = vmatprep.mubr.f32.mxu1 %v5523_v38 }
  0x4f   :  { %4291 = vmatmul.mubr.f32.gmra.mrb[4].mxu0 %v5519_v37 }
  0x50   :  { %4867 = vmatpush3.bf16.xpose.msra.mxu0 %v4864_v46  ;;  %4459 = vmatmul.mubr.f32.gmra.mrb[4].mxu1 %v5526_v39  ;;  %v7028_v46 = vld [vmem:[#allocation3_spill] sm:$0xff] }
  0x51   :  { %4963 = vmatpush3.bf16.xpose.msra.mxu1 %v4960_v54  ;;  %4869 = vmatprep.subr.bf16.mxu0 %v4868_v55  ;;  %v1766_v25 = vmul.f32 %v7028_v46, %v7028_v46  ;;  %v7029_v54 = vld [vmem:[#allocation2_spill] sm:$0xff]  ;;  %v4904_v46 = vpack.c.bf16 %v5723_v27, %v5720_v51 }
  0x52   :  { %4965 = vmatprep.subr.bf16.mxu1 %v4964_v34  ;;  %4293 = vmatprep.mubr.f32.mxu0 %v5598_v58  ;;  %v1758_v19 = vmul.f32 %v7029_v54, %v7029_v54 }
  0x53   :  { %4461 = vmatprep.mubr.f32.mxu1 %v5608_v62  ;;  %4294 = vmatmul.mubr.f32.gmra.mrb[6].mxu0 %v5601_v59  ;;  %v1808_v41 = vsel %vm28_vm0, %v1766_v25, 0.0  ;;  %v5000_v25 = vpack.c.bf16 %v5729_v43, %v5726_v61 }
  0x54   :  { %4462 = vmatmul.mubr.f32.gmra.mrb[6].mxu1 %v5611_v63  ;;  %4312 = vmatprep.mubr.f32.mxu0 %v5539_v42  ;;  %v1772_v42 = vsel %vm28_vm0, %v1754_v0, 0.0  ;;  %v7039_v0 = vld [vmem:[#allocation14_spill] sm:$0xff] }
  0x55   :  { %4480 = vmatprep.mubr.f32.mxu1 %v5552_v45  ;;  %1773 = vadd.xlane.f32.xlu0 %v1772_v42  ;;  %v1799_v45 = vsel %vm28_vm0, %v1763_v5, 0.0  ;;  %v4988_v5 = vpack.c.bf16 %v7043_v4, %v7039_v0  ;;  %v7044_v42 = vld [vmem:[#allocation19_spill] sm:$0xff] }
  0x56   :  { %1800 = vadd.xlane.f32.xlu1 %v1799_v45  ;;  %v4896_v45 = vpack.c.bf16 %v7045_v1, %v7044_v42 }
  0x58   :  { %4871 = vmatpush3.bf16.xpose.msra.mxu0 %v4868_v55  ;;  %v7030_v55 = vld [vmem:[#allocation5_spill] sm:$0xff] }
  0x59   :  { %4967 = vmatpush3.bf16.xpose.msra.mxu1 %v4964_v34  ;;  %4873 = vmatprep.subr.bf16.mxu0 %v4872_v24  ;;  %v7031_v34 = vld [vmem:[#allocation6_spill] sm:$0xff] }
  0x5a   :  { %4969 = vmatprep.subr.bf16.mxu1 %v4968_v44  ;;  %1776 = vadd.xlane.f32.xlu0 %v1775_v33  ;;  %v7047_v33 = vld [vmem:[#allocation22_spill] sm:$0xff] }
  0x5b   :  { %1803 = vadd.xlane.f32.xlu1 %v1802_v35  ;;  %v4992_v13 = vpack.c.bf16 %v7047_v33, %v7046_v30  ;;  %v7048_v35 = vld [vmem:[#allocation23_spill] sm:$0xff] }
  0x5e   :  { %1779 = vadd.xlane.f32.xlu0 %v1778_v47  ;;  %v4900_v47 = vpack.c.bf16 %v7049_v7, %v7048_v35 }
  0x5f   :  { %1806 = vadd.xlane.f32.xlu1 %v1805_v8  ;;  %v7051_v8 = vld [vmem:[#allocation26_spill] sm:$0xff] }
  0x60   :  { %4875 = vmatpush3.bf16.xpose.msra.mxu0 %v4872_v24  ;;  %v7042_v24 = vld [vmem:[#allocation15_spill] sm:$0xff] }
  0x61   :  { %4971 = vmatpush3.bf16.xpose.msra.mxu1 %v4968_v44  ;;  %4877 = vmatprep.subr.bf16.mxu0 %v5459_v21 }
  0x62   :  { %4973 = vmatprep.subr.bf16.mxu1 %v7027_v14  ;;  %1782 = vadd.xlane.f32.xlu0 %v1781_v3  ;;  %v4996_v3 = vpack.c.bf16 %v7051_v8, %v7050_v20 }
  0x63   :  { %1809 = vadd.xlane.f32.xlu1 %v1808_v41 }
  0x67   :  { %4313 = vmatmul.mubr.f32.vlgmr.msra.gmra.mrb[0].mxu0 %v5566_v49  ;;  %v1784_v49 = vsel %vm28_vm0, %v1758_v19, 0.0 }
  0x68   :  { %4879 = vmatpush3.bf16.xpose.msra.mxu0 %v5459_v21  ;;  %4481 = vmatmul.mubr.f32.vlgmr.msra.gmra.mrb[0].mxu1 %v5580_v53  ;;  %v7032_v53 = vld [vmem:[#allocation9_spill] sm:$0xff] }
  0x69   :  { %4975 = vmatpush3.bf16.xpose.msra.mxu1 %v7027_v14  ;;  %4881 = vmatprep.subr.bf16.mxu0 %v7030_v55  ;;  %v1767_v56 = vmul.f32 %v7032_v53, %v7032_v53 }
  0x6a   :  { %4977 = vmatprep.subr.bf16.mxu1 %v7031_v34  ;;  %4315 = vmatprep.mubr.f32.mxu0 %v5617_v6  ;;  %v7033_v6 = vld [vmem:[#allocation7_spill] sm:$0xff] }
  0x6b   :  { %4483 = vmatprep.mubr.f32.mxu1 %v5630_v57  ;;  %4316 = vmatmul.mubr.f32.gmra.mrb[2].mxu0 %v5620_v11  ;;  %v1759_v57 = vmul.f32 %v7033_v6, %v7033_v6  ;;  %v7034_v11 = vld [vmem:[#allocation11_spill] sm:$0xff] }
  0x6c   :  { %4484 = vmatmul.mubr.f32.gmra.mrb[2].mxu1 %v5639_v17  ;;  %4318 = vmatprep.mubr.f32.mxu0 %v5665_v52  ;;  %v7035_v17 = vld [vmem:[#allocation13_spill] sm:$0xff] }
  0x6d   :  { %4486 = vmatprep.mubr.f32.mxu1 %v5675_v48  ;;  %1785 = vadd.xlane.f32.xlu0 %v1784_v49  ;;  %v1811_v48 = vsel %vm28_vm0, %v1767_v56, 0.0  ;;  %v1787_v52 = vsel %vm28_vm0, %v1759_v57, 0.0  ;;  %v2141_v49 = vld [vmem:[%s6896_s1 + $0x1] sm:$0x1] }
  0x6e   :  { %1812 = vadd.xlane.f32.xlu1 %v1811_v48 }
  0x6f   :  { %4319 = vmatmul.mubr.f32.gmra.mrb[4].mxu0 %v5669_v16  ;;  %v7036_v16 = vld [vmem:[#allocation10_spill] sm:$0xff] }
  0x70   :  { %4883 = vmatpush3.bf16.xpose.msra.mxu0 %v7030_v55  ;;  %4487 = vmatmul.mubr.f32.gmra.mrb[4].mxu1 %v5679_v60  ;;  %v1768_v26 = vmul.f32 %v7036_v16, %v7036_v16  ;;  %v7037_v60 = vld [vmem:[#allocation12_spill] sm:$0xff] }
  0x71   :  { %4979 = vmatpush3.bf16.xpose.msra.mxu1 %v7031_v34  ;;  %4885 = vmatprep.subr.bf16.mxu0 %v7034_v11  ;;  %v4892_v44 = vpack.c.bf16 %v7042_v24, %v7037_v60 }
  0x72   :  { %4981 = vmatprep.subr.bf16.mxu1 %v7035_v17  ;;  %4321 = vmatprep.mubr.f32.mxu0 %v5697_v40  ;;  %v1814_v40 = vsel %vm28_vm0, %v1768_v26, 0.0  ;;  %v2143_v26 = vunpack.c.0.s8 %v2141_v49 }
  0x73   :  { %4489 = vmatprep.mubr.f32.mxu1 %v5709_v50  ;;  %4322 = vmatmul.mubr.f32.gmra.mrb[6].mxu0 %v5705_v31  ;;  %v1790_v31 = vsel %vm28_vm0, %v1760_v18, 0.0  ;;  %v7040_v50 = vld [vmem:[#allocation17_spill] sm:$0xff] }
  0x74   :  { %4490 = vmatmul.mubr.f32.gmra.mrb[6].mxu1 %v5717_v32  ;;  %4340 = vmatprep.mubr.f32.mxu0 %v7037_v60  ;;  %v7041_v32 = vld [vmem:[#allocation18_spill] sm:$0xff] }
  0x75   :  { %4508 = vmatprep.mubr.f32.mxu1 %v7039_v0  ;;  %1788 = vadd.xlane.f32.xlu0 %v1787_v52 }
  0x76   :  { %1815 = vadd.xlane.f32.xlu1 %v1814_v40 }
  0x78   :  { %4887 = vmatpush3.bf16.xpose.msra.mxu0 %v7034_v11 }
  0x79   :  { %4983 = vmatpush3.bf16.xpose.msra.mxu1 %v7035_v17  ;;  %4889 = vmatprep.subr.bf16.mxu0 %v7040_v50 }
  0x7a   :  { %4985 = vmatprep.subr.bf16.mxu1 %v7041_v32  ;;  %1791 = vadd.xlane.f32.xlu0 %v1790_v31 }
  0x80   :  { %4891 = vmatpush3.bf16.xpose.msra.mxu0 %v7040_v50 }
  0x81   :  { %4987 = vmatpush3.bf16.xpose.msra.mxu1 %v7041_v32  ;;  %4893 = vmatprep.subr.bf16.mxu0 %v4892_v44 }
  0x82   :  { %4989 = vmatprep.subr.bf16.mxu1 %v4988_v5 }
  0x87   :  { %4341 = vmatmul.mubr.f32.vlgmr.msra.gmra.mrb[0].mxu0 %v7042_v24  ;;  %v6018_v24 = vcvt.s32.f32 %v2143_v26 }
  0x88   :  { %4895 = vmatpush3.bf16.xpose.msra.mxu0 %v4892_v44  ;;  %4509 = vmatmul.mubr.f32.vlgmr.msra.gmra.mrb[0].mxu1 %v7043_v4 }
  0x89   :  { %4991 = vmatpush3.bf16.xpose.msra.mxu1 %v4988_v5  ;;  %4897 = vmatprep.subr.bf16.mxu0 %v4896_v45  ;;  %7061 = vst [vmem:[#allocation10_spill] sm:$0xff] %v6018_v24 }
  0x8a   :  { %4993 = vmatprep.subr.bf16.mxu1 %v4992_v13  ;;  %4343 = vmatprep.mubr.f32.mxu0 %v7044_v42 }
  0x8b   :  { %4511 = vmatprep.mubr.f32.mxu1 %v7046_v30  ;;  %4344 = vmatmul.mubr.f32.gmra.mrb[2].mxu0 %v7045_v1 }
  0x8c   :  { %4512 = vmatmul.mubr.f32.gmra.mrb[2].mxu1 %v7047_v33  ;;  %4346 = vmatprep.mubr.f32.mxu0 %v7048_v35 }
  0x8d   :  { %4514 = vmatprep.mubr.f32.mxu1 %v7050_v20 }
  0x8f   :  { %4347 = vmatmul.mubr.f32.gmra.mrb[4].mxu0 %v7049_v7 }
  0x90   :  { %4899 = vmatpush3.bf16.xpose.msra.mxu0 %v4896_v45  ;;  %4515 = vmatmul.mubr.f32.gmra.mrb[4].mxu1 %v7051_v8 }
  0x91   :  { %4995 = vmatpush3.bf16.xpose.msra.mxu1 %v4992_v13  ;;  %4901 = vmatprep.subr.bf16.mxu0 %v4900_v47 }
  0x92   :  { %4997 = vmatprep.subr.bf16.mxu1 %v4996_v3  ;;  %4349 = vmatprep.mubr.f32.mxu0 %v5720_v51 }
  0x93   :  { %4517 = vmatprep.mubr.f32.mxu1 %v5726_v61  ;;  %4350 = vmatmul.mubr.f32.gmra.mrb[6].mxu0 %v5723_v27 }
  0x94   :  { %4518 = vmatmul.mubr.f32.gmra.mrb[6].mxu1 %v5729_v43  ;;  %4368 = vmatprep.mubr.f32.mxu0 %v5419_v9 }
  0x95   :  { %4536 = vmatprep.mubr.f32.mxu1 %v5425_v12 }
  0x98   :  { %4903 = vmatpush3.bf16.xpose.msra.mxu0 %v4900_v47  ;;  %v2792_v47 = vsel %vm2250_vm6, %v6018_v24, 0 }
  0x99   :  { %4999 = vmatpush3.bf16.xpose.msra.mxu1 %v4996_v3  ;;  %4905 = vmatprep.subr.bf16.mxu0 %v4904_v46 }
  0x9a   :  { %5001 = vmatprep.subr.bf16.mxu1 %v5000_v25 }
  0xa0   :  { %4907 = vmatpush3.bf16.xpose.msra.mxu0 %v4904_v46 }
  0xa1   :  { %5003 = vmatpush3.bf16.xpose.msra.mxu1 %v5000_v25  ;;  %4909 = vmatprep.subr.bf16.mxu0 %v5459_v21 }
  0xa2   :  { %5005 = vmatprep.subr.bf16.mxu1 %v7027_v14 }
  0xa7   :  { %4369 = vmatmul.mubr.f32.vlgmr.msra.gmra.mrb[0].mxu0 %v5421_v10 }
  0xa8   :  { %4911 = vmatpush3.bf16.xpose.msra.mxu0 %v5459_v21  ;;  %4537 = vmatmul.mubr.f32.vlgmr.msra.gmra.mrb[0].mxu1 %v5437_v15 }
  0xa9   :  { %5007 = vmatpush3.bf16.xpose.msra.mxu1 %v7027_v14  ;;  %4913 = vmatprep.subr.bf16.mxu0 %v7030_v55 }
  0xaa   :  { %5009 = vmatprep.subr.bf16.mxu1 %v7031_v34  ;;  %4371 = vmatprep.mubr.f32.mxu0 %v5461_v22 }
  0xab   :  { %4539 = vmatprep.mubr.f32.mxu1 %v5482_v28  ;;  %4372 = vmatmul.mubr.f32.gmra.mrb[2].mxu0 %v5463_v23 }
  0xac   :  { %4540 = vmatmul.mubr.f32.gmra.mrb[2].mxu1 %v5484_v29  ;;  %4374 = vmatprep.mubr.f32.mxu0 %v5516_v36 }
  0xad   :  { %4542 = vmatprep.mubr.f32.mxu1 %v5523_v38 }
  0xaf   :  { %4375 = vmatmul.mubr.f32.gmra.mrb[4].mxu0 %v5519_v37 }
  0xb0   :  { %4915 = vmatpush3.bf16.xpose.msra.mxu0 %v7030_v55  ;;  %4543 = vmatmul.mubr.f32.gmra.mrb[4].mxu1 %v5526_v39 }
  0xb1   :  { %5011 = vmatpush3.bf16.xpose.msra.mxu1 %v7031_v34  ;;  %4917 = vmatprep.subr.bf16.mxu0 %v7034_v11  ;;  %v2140_v34 = vld [vmem:[%s6896_s1] sm:$0x1] }
  0xb2   :  { %5013 = vmatprep.subr.bf16.mxu1 %v7035_v17  ;;  %4377 = vmatprep.mubr.f32.mxu0 %v5598_v58 }
  0xb3   :  { %4545 = vmatprep.mubr.f32.mxu1 %v5608_v62  ;;  %4378 = vmatmul.mubr.f32.gmra.mrb[6].mxu0 %v5601_v59 }
  0xb4   :  { %4546 = vmatmul.mubr.f32.gmra.mrb[6].mxu1 %v5611_v63  ;;  %4396 = vmatprep.mubr.f32.mxu0 %v5419_v9  ;;  %v6945_v9 = vmov 0.0|0.0  }
  0xb5   :  { %4564 = vmatprep.mubr.f32.mxu1 %v5425_v12 }
  0xb8   :  { %4919 = vmatpush3.bf16.xpose.msra.mxu0 %v7034_v11 }
  0xb9   :  { %5015 = vmatpush3.bf16.xpose.msra.mxu1 %v7035_v17  ;;  %4921 = vmatprep.subr.bf16.mxu0 %v7040_v50  ;;  %v2142_v17 = vunpack.c.0.s8 %v2140_v34 }
  0xba   :  { %5017 = vmatprep.subr.bf16.mxu1 %v7041_v32 }
  0xc0   :  { %4923 = vmatpush3.bf16.xpose.msra.mxu0 %v7040_v50  ;;  %v6013_v50 = vcvt.s32.f32 %v2142_v17 }
  0xc1   :  { %5019 = vmatpush3.bf16.xpose.msra.mxu1 %v7041_v32  ;;  %5020 = vmatprep.subr.bf16.mxu0 %v6945_v9 }
  0xc2   :  { %5092 = vmatprep.subr.bf16.mxu1 %v6945_v9  ;;  %7059 = vst [vmem:[#allocation11_spill] sm:$0xff] %v6013_v50  ;;  %v2252_v13 = vsel %vm2250_vm6, %v6013_v50, 0 }
  0xc3   :  { %v6045_v46 = vand.u32 4294901760, %v2252_v13 }
  0xc5   :  { %v6057_v34 = vsub.f32 %v2252_v13, %v6045_v46 }
  0xc7   :  { %4397 = vmatmul.mubr.f32.vlgmr.msra.gmra.mrb[0].mxu0 %v5421_v10  ;;  %v5935_v12 = vpop.xlane.xlu0 %1770 }
  0xc8   :  { %4565 = vmatmul.mubr.f32.vlgmr.msra.gmra.mrb[0].mxu1 %v5437_v15  ;;  %4399 = vmatprep.mubr.f32.mxu0 %v5461_v22  ;;  %v5933_v10 = vpop.xlane.xlu1 %1794  ;;  %v6943_v15 = vmov 0.0  }
  0xc9   :  { %4567 = vmatprep.mubr.f32.mxu1 %v5482_v28 }
  0xcb   :  { %4400 = vmatmul.mubr.f32.gmra.mrb[2].mxu0 %v5463_v23  ;;  %v1833_v23 = vlaneseq }
  0xcc   :  { %4568 = vmatmul.mubr.f32.gmra.mrb[2].mxu1 %v5484_v29  ;;  %4402 = vmatprep.mubr.f32.mxu0 %v5516_v36  ;;  %v5941_v21 = vpop.xlane.xlu1 %1797 }
  0xcd   :  { %4570 = vmatprep.mubr.f32.mxu1 %v5523_v38  ;;  %v5949_v29 = vand.u32 127, %v1833_v23  ;;  %v5955_v38 = vshrl.u32 %v1833_v23, 7 }
  0xcf   :  { %4403 = vmatmul.mubr.f32.gmra.mrb[4].mxu0 %v5519_v37  ;;  %7052 = vst [vmem:[#allocation4_spill] sm:$0xff] %v5949_v29  ;;  %7053 = vst [vmem:[#allocation3_spill] sm:$0xff] %v5955_v38  ;;  %v1853_v51 = vadd.s32 4294967272, %v5949_v29  ;;  %v1860_v41 = vadd.s32 4294967264, %v5949_v29  ;;  %v1867_v16 = vadd.s32 4294967256, %v5949_v29  ;;  %v1874_v31 = vadd.s32 4294967248, %v5949_v29 }
  0xd0   :  { %4571 = vmatmul.mubr.f32.gmra.mrb[4].mxu1 %v5526_v39  ;;  %4405 = vmatprep.mubr.f32.mxu0 %v5598_v58  ;;  %v1839_v39 = vadd.s32 4294967288, %v5949_v29  ;;  %v1846_v58 = vadd.s32 4294967280, %v5949_v29  ;;  %v1881_v30 = vadd.s32 4294967240, %v5949_v29 }
  0xd1   :  { %4573 = vmatprep.mubr.f32.mxu1 %v5608_v62  ;;  %v5990_v53 = vsub.s32 %v1853_v51, %v5955_v38  ;;  %v6004_v60 = vsub.s32 %v1860_v41, %v5955_v38  ;;  %v6016_v32 = vsub.s32 %v1867_v16, %v5955_v38  ;;  %v6030_v33 = vsub.s32 %v1874_v31, %v5955_v38 }
  0xd2   :  { %v5964_v61 = vsub.s32 %v1839_v39, %v5955_v38  ;;  %v5972_v43 = vsub.s32 %v1846_v58, %v5955_v38  ;;  %v6043_v3 = vsub.s32 %v1881_v30, %v5955_v38  ;;  %v6050_v51 = vand.u32 4294901760, %v2792_v47 }
  0xd3   :  { %4406 = vmatmul.mubr.f32.gmra.mrb[6].mxu0 %v5601_v59  ;;  %v5961_v59 = vsub.s32 %v5949_v29, %v5955_v38  ;;  %7057 = vst [vmem:[#allocation9_spill] sm:$0xff] %v5990_v53  ;;  %7058 = vst [vmem:[#allocation7_spill] sm:$0xff] %v6004_v60 }
  0xd4   :  { %4574 = vmatmul.mubr.f32.gmra.mrb[6].mxu1 %v5611_v63  ;;  %4592 = vmatprep.mubr.msk.f32.mxu0 %vm5362_vm2, %v6943_v15  ;;  %7055 = vst [vmem:[#allocation5_spill] sm:$0xff] %v5964_v61  ;;  %7056 = vst [vmem:[#allocation6_spill] sm:$0xff] %v5972_v43  ;;  %v1895_v19 = vrot.slane %v5941_v21, %v5964_v61 }
  0xd5   :  { %4706 = vmatprep.mubr.msk.f32.mxu1 %vm5362_vm2, %v6943_v15  ;;  %7054 = vst [vmem:[#allocation2_spill] sm:$0xff] %v5961_v59  ;;  %v1891_v14 = vrot.slane %v5933_v10, %v5961_v59  ;;  %v1838_v54 = vrot.slane %v5935_v12, %v5961_v59  ;;  %7060 = vst [vmem:[#allocation13_spill] sm:$0xff] %v6016_v32 }
  0xd6   :  { %7062 = vst [vmem:[#allocation12_spill] sm:$0xff] %v6030_v33  ;;  %7063 = vst [vmem:[#allocation8_spill] sm:$0xff] %v6043_v3 }
  0xd7   :  { %v1896_v48 = vsel %vm7001_vm3, %v1895_v19, %v1891_v14 }
  0xe2   :  { %v5943_v22 = vpop.xlane.xlu0 %1773 }
  0xe3   :  { %v5945_v27 = vpop.xlane.xlu1 %1800  ;;  %v1843_v55 = vrot.slane %v5943_v22, %v5964_v61 }
  0xe4   :  { %v1900_v56 = vrot.slane %v5945_v27, %v5972_v43 }
  0xe5   :  { %v1845_v52 = vsel %vm7001_vm3, %v1843_v55, %v1838_v54 }
  0xe6   :  { %v1901_v0 = vsel %vm7000_vm4, %v1900_v56, %v1896_v48  ;;  %v6062_v56 = vsub.f32 %v2792_v47, %v6050_v51  ;;  %v6942_v48 = vand.u32 4294901760, %v6057_v34 }
  0xe7   :  { %v5947_v28 = vpop.xlane.xlu0 %1776 }
  0xe8   :  { %v5951_v36 = vpop.xlane.xlu1 %1803  ;;  %v1850_v6 = vrot.slane %v5947_v28, %v5972_v43  ;;  %7064 = vst [vmem:[#allocation14_spill] sm:$0xff] %v6062_v56 }
  0xe9   :  { %v1905_v2 = vrot.slane %v5951_v36, %v5990_v53 }
  0xea   :  { %v1852_v40 = vsel %vm7000_vm4, %v1850_v6, %v1845_v52  ;;  %v6941_v52 = vand.u32 4294901760, %v6062_v56 }
  0xeb   :  { %v5953_v37 = vpop.xlane.xlu0 %1779  ;;  %v1906_v1 = vsel %vm6999_vm5, %v1905_v2, %v1901_v0 }
  0xec   :  { %v5966_v62 = vpop.xlane.xlu1 %1806  ;;  %v1857_v18 = vrot.slane %v5953_v37, %v5990_v53 }
  0xed   :  { %v1910_v44 = vrot.slane %v5966_v62, %v6004_v60 }
  0xee   :  { %v1859_v45 = vsel %vm6999_vm5, %v1857_v18, %v1852_v40 }
  0xef   :  { %v5968_v63 = vpop.xlane.xlu0 %1782  ;;  %v1911_v20 = vsel %vm6998_vm7, %v1910_v44, %v1906_v1 }
  0xf0   :  { %v5996_v57 = vpop.xlane.xlu1 %1809  ;;  %v1864_v4 = vrot.slane %v5968_v63, %v6004_v60 }
  0xf1   :  { %v1915_v35 = vrot.slane %v5996_v57, %v6016_v32 }
  0xf2   :  { %v1866_v8 = vsel %vm6998_vm7, %v1864_v4, %v1859_v45  ;;  %v6082_v45 = vsub.f32 %v6057_v34, %v6942_v48 }
  0xf3   :  { %v1916_v14 = vsel %vm6997_vm8, %v1915_v35, %v1911_v20 }
  0xfa   :  { %v5998_v11 = vpop.xlane.xlu0 %1785 }
  0xfb   :  { %v6024_v5 = vpop.xlane.xlu1 %1812  ;;  %v1871_v7 = vrot.slane %v5998_v11, %v6016_v32 }
  0xfc   :  { %v1920_v25 = vrot.slane %v6024_v5, %v6030_v33 }
  0xfd   :  { %v1873_v54 = vsel %vm6997_vm8, %v1871_v7, %v1866_v8 }
  0xfe   :  { %v1921_v41 = vsel %vm6996_vm9, %v1920_v25, %v1916_v14 }
 0x102   :  { %v1789_v42 = vpop.xlane.xlu0 %1788 }
 0x103   :  { %v1878_v23 = vrot.slane %v1789_v42, %v6030_v33  ;;  %v1816_v39 = vpop.xlane.xlu1 %1815 }
 0x104   :  { %v1925_v19 = vrot.slane %v1816_v39, %v6043_v3 }
 0x105   :  { %v1880_v49 = vsel %vm6996_vm9, %v1878_v23, %v1873_v54 }
 0x106   :  { %v1926_v6 = vsel %vm6995_vm10, %v1925_v19, %v1921_v41 }
 0x107   :  { %v1792_v58 = vpop.xlane.xlu0 %1791  ;;  %v6068_v16 = vadd.f32 %v1926_v6, %v1816_v39  ;;  %v1957_v26 = vadd.f32 %v1926_v6, %v5941_v21  ;;  %v1956_v40 = vadd.f32 %v1926_v6, %v5933_v10  ;;  %v1959_v4 = vadd.f32 %v1926_v6, %v5951_v36 }
 0x108   :  { %v1885_v55 = vrot.slane %v1792_v58, %v6043_v3  ;;  %v6091_v10 = vsub.f32 %v6062_v56, %v6941_v52  ;;  %v6094_v35 = vadd.f32 %v1926_v6, %v5996_v57  ;;  %v6105_v39 = vadd.f32 %v1926_v6, %v6024_v5 }
 0x10a   :  { %v1887_v17 = vsel %vm6995_vm10, %v1885_v55, %v1880_v49 }
 0x10b   :  { %v6071_v2 = vadd.f32 %v1887_v17, %v1792_v58  ;;  %v1949_v18 = vadd.f32 %v1887_v17, %v5943_v22  ;;  %v1948_v0 = vadd.f32 %v1887_v17, %v5935_v12  ;;  %v1951_v44 = vadd.f32 %v1887_v17, %v5953_v37 }
 0x10c   :  { %v1950_v1 = vadd.f32 %v1887_v17, %v5947_v28  ;;  %v1958_v22 = vadd.f32 %v1926_v6, %v5945_v27  ;;  %v6086_v12 = vadd.f32 %v1887_v17, %v5998_v11  ;;  %v6097_v7 = vadd.f32 %v1887_v17, %v5968_v63 }
 0x10d   :  { %v6100_v27 = vadd.f32 %v1926_v6, %v5966_v62  ;;  %v6102_v11 = vadd.f32 %v1887_v17, %v1789_v42 }
 0x19a   :  { %v4398_v31 = vpop.f32.mrb[0].mxu0 }
 0x19b   :  { %v1965_v21 = vmul.f32 2.0, %v4398_v31  ;;  %v4566_v30 = vpop.f32.mrb[0].mxu1  ;;  %v845_v13 = vpop.f32.mrb[1].mxu0 }
 0x19c   :  { %v1973_v36 = vmul.f32 2.0, %v4566_v30  ;;  %v1964_v28 = vmul.f32 2.0, %v845_v13  ;;  %v1707_v37 = vpop.f32.mrb[1].mxu1 }
 0x19d   :  { %v1981_v47 = vsub.f32 %v1949_v18, %v1965_v21  ;;  %v1972_v20 = vmul.f32 2.0, %v1707_v37 }
 0x19e   :  { %v1989_v8 = vsub.f32 %v1957_v26, %v1973_v36  ;;  %v1980_v25 = vsub.f32 %v1948_v0, %v1964_v28  ;;  %v4401_v23 = vpop.f32.mrb[2].mxu0 }
 0x19f   :  { %v1997_v57 = vmax.f32 %v1981_v47, 0.0  ;;  %v1988_v14 = vsub.f32 %v1956_v40, %v1972_v20  ;;  %v1967_v54 = vmul.f32 2.0, %v4401_v23  ;;  %v4569_v63 = vpop.f32.mrb[2].mxu1  ;;  %v857_v19 = vpop.f32.mrb[3].mxu0 }
 0x1a0   :  { %v2005_v41 = vmax.f32 %v1989_v8, 0.0  ;;  %v1996_v62 = vmax.f32 %v1980_v25, 0.0  ;;  %v1975_v49 = vmul.f32 2.0, %v4569_v63  ;;  %v1966_v42 = vmul.f32 2.0, %v857_v19  ;;  %v1719_v17 = vpop.f32.mrb[3].mxu1 }
 0x1a1   :  { %v6109_v26 = vadd.f32 1e-07, %v1997_v57  ;;  %v2004_v18 = vmax.f32 %v1988_v14, 0.0  ;;  %v1983_v0 = vsub.f32 %v1951_v44, %v1967_v54  ;;  %v1974_v5 = vmul.f32 2.0, %v1719_v17 }
 0x1a2   :  { %v6111_v6 = vadd.f32 1e-07, %v2005_v41  ;;  %v6113_v31 = vadd.f32 1e-07, %v1996_v62  ;;  %v1991_v40 = vsub.f32 %v1959_v4, %v1975_v49  ;;  %v1982_v21 = vsub.f32 %v1950_v1, %v1966_v42  ;;  %v4404_v30 = vpop.f32.mrb[4].mxu0 }
 0x1a3   :  { %5295 = vrsqrt.f32 %v6109_v26  ;;  %v6116_v13 = vadd.f32 1e-07, %v2004_v18  ;;  %v1999_v36 = vmax.f32 %v1983_v0, 0.0  ;;  %v1990_v28 = vsub.f32 %v1958_v22, %v1974_v5  ;;  %v4572_v37 = vpop.f32.mrb[4].mxu1  ;;  %v869_v47 = vpop.f32.mrb[5].mxu0 }
 0x1a4   :  { %5297 = vrsqrt.f32 %v6111_v6  ;;  %v2007_v20 = vmax.f32 %v1991_v40, 0.0  ;;  %v1998_v44 = vmax.f32 %v1982_v21, 0.0  ;;  %v1969_v8 = vmul.f32 2.0, %v4404_v30  ;;  %v1731_v25 = vpop.f32.mrb[5].mxu1 }
 0x1a5   :  { %5299 = vrsqrt.f32 %v6113_v31  ;;  %v6120_v23 = vadd.f32 1e-07, %v1999_v36  ;;  %v2006_v4 = vmax.f32 %v1990_v28, 0.0  ;;  %v1977_v1 = vmul.f32 2.0, %v4572_v37 }
 0x1a6   :  { %5301 = vrsqrt.f32 %v6116_v13  ;;  %v6123_v57 = vadd.f32 1e-07, %v2007_v20  ;;  %v6125_v14 = vadd.f32 1e-07, %v1998_v44  ;;  %v1985_v22 = vsub.f32 %v6086_v12, %v1969_v8  ;;  %v4407_v54 = vpop.f32.mrb[6].mxu0 }
 0x1a7   :  { %5303 = vrsqrt.f32 %v6120_v23  ;;  %v6129_v63 = vadd.f32 1e-07, %v2006_v4  ;;  %v1993_v19 = vsub.f32 %v6094_v35, %v1977_v1  ;;  %v1968_v41 = vmul.f32 2.0, %v869_v47  ;;  %v4575_v62 = vpop.f32.mrb[6].mxu1  ;;  %v881_v49 = vpop.f32.mrb[7].mxu0 }
 0x1a8   :  { %5305 = vrsqrt.f32 %v6123_v57  ;;  %v2001_v42 = vmax.f32 %v1985_v22, 0.0  ;;  %v1976_v17 = vmul.f32 2.0, %v1731_v25  ;;  %v1971_v18 = vmul.f32 2.0, %v4407_v54  ;;  %v1743_v0 = vpop.f32.mrb[7].mxu1 }
 0x1a9   :  { %5307 = vrsqrt.f32 %v6125_v14  ;;  %v2009_v5 = vmax.f32 %v1993_v19, 0.0  ;;  %v1984_v12 = vsub.f32 %v6097_v7, %v1968_v41  ;;  %v1979_v40 = vmul.f32 2.0, %v4575_v62 }
 0x1aa   :  { %5309 = vrsqrt.f32 %v6129_v63  ;;  %v6136_v21 = vadd.f32 1e-07, %v2001_v42  ;;  %v1992_v35 = vsub.f32 %v6100_v27, %v1976_v17  ;;  %v1987_v30 = vsub.f32 %v6071_v2, %v1971_v18 }
 0x1ab   :  { %v6140_v36 = vadd.f32 1e-07, %v2009_v5  ;;  %v2000_v28 = vmax.f32 %v1984_v12, 0.0  ;;  %v1995_v37 = vsub.f32 %v6068_v16, %v1979_v40  ;;  %v1970_v47 = vmul.f32 2.0, %v881_v49 }
 0x1ac   :  { %5311 = vrsqrt.f32 %v6136_v21  ;;  %v2008_v20 = vmax.f32 %v1992_v35, 0.0  ;;  %v2003_v44 = vmax.f32 %v1987_v30, 0.0  ;;  %v1978_v7 = vmul.f32 2.0, %v1743_v0 }
 0x1ad   :  { %v5296_v8 = vpop.eup %5295  ;;  %5313 = vrsqrt.f32 %v6140_v36  ;;  %v6145_v25 = vadd.f32 1e-07, %v2000_v28  ;;  %v2011_v4 = vmax.f32 %v1995_v37, 0.0  ;;  %v1986_v27 = vsub.f32 %v6102_v11, %v1970_v47 }
 0x1ae   :  { %v5298_v2 = vpop.eup %5297  ;;  %v6148_v1 = vadd.f32 1e-07, %v2008_v20  ;;  %v6150_v22 = vadd.f32 1e-07, %v2003_v44  ;;  %v1994_v16 = vsub.f32 %v6105_v39, %v1978_v7  ;;  %vm2030_vm11 = vcmp.eq.f32.partialorder %v6113_v31, inf }
 0x1af   :  { %v5300_v54 = vpop.eup %5299  ;;  %5315 = vrsqrt.f32 %v6145_v25  ;;  %v6155_v19 = vadd.f32 1e-07, %v2011_v4  ;;  %v2002_v41 = vmax.f32 %v1986_v27, 0.0  ;;  %vm2032_vm12 = vcmp.eq.f32.partialorder %v6113_v31, 0.0 }
 0x1b0   :  { %v5302_v62 = vpop.eup %5301  ;;  %5317 = vrsqrt.f32 %v6148_v1  ;;  %v2010_v11 = vmax.f32 %v1994_v16, 0.0  ;;  %v2029_v49 = vmul.f32 %v5300_v54, %v6113_v31  ;;  %v2033_v42 = vand.u32 2147483648, %v6113_v31 }
 0x1b1   :  { %v5304_v17 = vpop.eup %5303  ;;  %5319 = vrsqrt.f32 %v6150_v22  ;;  %v6162_v39 = vadd.f32 1e-07, %v2002_v41  ;;  %v2036_v18 = vmul.f32 %v5296_v8, %v6109_v26  ;;  %vm2037_vm13 = vcmp.eq.f32.partialorder %v6109_v26, inf }
 0x1b2   :  { %v6166_v0 = vpop.eup %5305  ;;  %5321 = vrsqrt.f32 %v6155_v19  ;;  %v6169_v5 = vadd.f32 1e-07, %v2010_v11  ;;  %v2031_v12 = vsel %vm2030_vm11, %v6113_v31, %v2029_v49  ;;  %vm2039_vm14 = vcmp.eq.f32.partialorder %v6109_v26, 0.0 }
 0x1b3   :  { %v5308_v40 = vpop.eup %5307  ;;  %5323 = vrsqrt.f32 %v6162_v39  ;;  %v6178_v35 = vsel %vm2032_vm12, %v2033_v42, %v2031_v12  ;;  %v2038_v30 = vsel %vm2037_vm13, %v6109_v26, %v2036_v18  ;;  %v2040_v28 = vand.u32 2147483648, %v6109_v26 }
 0x1b4   :  { %v5310_v37 = vpop.eup %5309  ;;  %5325 = vrsqrt.f32 %v6169_v5  ;;  %v3878_v47 = vadd.f32 -0.1, %v6178_v35  ;;  %v2085_v20 = vmul.f32 %v5302_v62, %v6116_v13  ;;  %vm2086_vm15 = vcmp.eq.f32.partialorder %v6116_v13, inf }
 0x1b5   :  { %v6186_v44 = vsel %vm2039_vm14, %v2040_v28, %v2038_v30  ;;  %vm2088_vm0 = vcmp.eq.f32.partialorder %v6116_v13, 0.0  ;;  %v2089_v31 = vand.u32 2147483648, %v6116_v13  ;;  %v2092_v7 = vmul.f32 %v5298_v2, %v6111_v6 }
 0x1b6   :  { %v6191_v8 = vpop.eup %5311  ;;  %v3879_v26 = vadd.f32 -0.1, %v6186_v44  ;;  %v2162_v4 = vmax.f32 %v3878_v47, 0.0  ;;  %v2087_v27 = vsel %vm2086_vm15, %v6116_v13, %v2085_v20  ;;  %vm2093_vm11 = vcmp.eq.f32.partialorder %v6111_v6, inf }
 0x1b7   :  { %v6196_v16 = vpop.eup %5313  ;;  %v6198_v54 = vsel %vm2088_vm0, %v2089_v31, %v2087_v27  ;;  %v2094_v41 = vsel %vm2093_vm11, %v6111_v6, %v2092_v7  ;;  %vm2095_vm12 = vcmp.eq.f32.partialorder %v6111_v6, 0.0  ;;  %v2096_v62 = vand.u32 2147483648, %v6111_v6 }
 0x1b8   :  { %v2163_v2 = vmax.f32 %v3879_v26, 0.0  ;;  %v2178_v11 = vmul.f32 %v2162_v4, %v2162_v4  ;;  %v3886_v49 = vadd.f32 -0.1, %v6198_v54  ;;  %v2043_v42 = vmul.f32 %v5308_v40, %v6125_v14 }
 0x1b9   :  { %v5316_v18 = vpop.eup %5315  ;;  %v6205_v13 = vsel %vm2095_vm12, %v2096_v62, %v2094_v41  ;;  %vm2044_vm13 = vcmp.eq.f32.partialorder %v6125_v14, inf  ;;  %vm2046_vm14 = vcmp.eq.f32.partialorder %v6125_v14, 0.0  ;;  %v2047_v12 = vand.u32 2147483648, %v6125_v14 }
 0x1ba   :  { %v6210_v30 = vpop.eup %5317  ;;  %v2179_v28 = vmul.f32 %v2163_v2, %v2163_v2  ;;  %v2255_v47 = vand.u32 4294901760, %v2178_v11  ;;  %v3887_v6 = vadd.f32 -0.1, %v6205_v13  ;;  %v2170_v20 = vmax.f32 %v3886_v49, 0.0 }
 0x1bb   :  { %v6213_v31 = vpop.eup %5319  ;;  %v2045_v40 = vsel %vm2044_vm13, %v6125_v14, %v2043_v42  ;;  %v2050_v7 = vmul.f32 %v5304_v17, %v6120_v23  ;;  %vm2051_vm15 = vcmp.eq.f32.partialorder %v6120_v23, inf  ;;  %vm2053_vm0 = vcmp.eq.f32.partialorder %v6120_v23, 0.0 }
 0x1bc   :  { %v6219_v26 = vpop.eup %5321  ;;  %v2258_v4 = vand.u32 4294901760, %v2179_v28  ;;  %v6221_v27 = vsub.f32 %v2178_v11, %v2255_v47  ;;  %v2171_v41 = vmax.f32 %v3887_v6, 0.0  ;;  %v2186_v62 = vmul.f32 %v2170_v20, %v2170_v20 }
 0x1bd   :  { %v6223_v2 = vpop.eup %5323  ;;  %v6227_v49 = vsel %vm2046_vm14, %v2047_v12, %v2045_v40  ;;  %v2052_v42 = vsel %vm2051_vm15, %v6120_v23, %v2050_v7  ;;  %v2054_v17 = vand.u32 2147483648, %v6120_v23  ;;  %v2099_v52 = vmul.f32 %v5310_v37, %v6129_v63 }
 0x1be   :  { %v6232_v48 = vpop.eup %5325  ;;  %v6234_v55 = vpack.c.bf16 %v2258_v4, %v2255_v47  ;;  %v6236_v11 = vsub.f32 %v2179_v28, %v2258_v4  ;;  %v2187_v6 = vmul.f32 %v2171_v41, %v2171_v41  ;;  %v2795_v20 = vand.u32 4294901760, %v2186_v62 }
 0x1bf   :  { %v6240_v15 = vsel %vm2053_vm0, %v2054_v17, %v2052_v42  ;;  %v3880_v14 = vadd.f32 -0.1, %v6227_v49  ;;  %vm2100_vm11 = vcmp.eq.f32.partialorder %v6129_v63, inf  ;;  %vm2102_vm12 = vcmp.eq.f32.partialorder %v6129_v63, 0.0 }
 0x1c0   :  { %5022 = vmatpush3.bf16.msra.mxu0 %v6234_v55  ;;  %v2798_v37 = vand.u32 4294901760, %v2187_v6  ;;  %v6246_v12 = vsub.f32 %v2186_v62, %v2795_v20  ;;  %v3881_v28 = vadd.f32 -0.1, %v6240_v15  ;;  %v2101_v47 = vsel %vm2100_vm11, %v6129_v63, %v2099_v52 }
 0x1c1   :  { %5023 = vmatprep.subr.bf16.mxu0 %v6945_v9  ;;  %v2164_v23 = vmax.f32 %v3880_v14, 0.0  ;;  %v2103_v40 = vand.u32 2147483648, %v6129_v63  ;;  %v2106_v7 = vmul.f32 %v6166_v0, %v6123_v57  ;;  %vm2107_vm13 = vcmp.eq.f32.partialorder %v6123_v57, inf }
 0x1c2   :  { %v6255_v4 = vpack.c.bf16 %v2798_v37, %v2795_v20  ;;  %v6257_v41 = vsub.f32 %v2187_v6, %v2798_v37  ;;  %v2165_v62 = vmax.f32 %v3881_v28, 0.0  ;;  %vm2109_vm14 = vcmp.eq.f32.partialorder %v6123_v57, 0.0 }
 0x1c3   :  { %v2180_v42 = vmul.f32 %v2164_v23, %v2164_v23  ;;  %v6262_v52 = vsel %vm2102_vm12, %v2103_v40, %v2101_v47  ;;  %v2108_v17 = vsel %vm2107_vm13, %v6123_v57, %v2106_v7  ;;  %v2110_v14 = vand.u32 2147483648, %v6123_v57 }
 0x1c4   :  { %7065 = vst [vmem:[#allocation17_spill] sm:$0xff] %v6255_v4  ;;  %5094 = vmatpush3.bf16.msra.mxu1 %v6255_v4  ;;  %v2181_v0 = vmul.f32 %v2165_v62, %v2165_v62  ;;  %v3888_v20 = vadd.f32 -0.1, %v6262_v52  ;;  %v2057_v6 = vmul.f32 %v5316_v18, %v6145_v25  ;;  %vm2058_vm15 = vcmp.eq.f32.partialorder %v6145_v25, inf }
 0x1c5   :  { %5095 = vmatprep.subr.bf16.mxu1 %v6945_v9  ;;  %v2261_v37 = vand.u32 4294901760, %v2180_v42  ;;  %v6271_v28 = vsel %vm2109_vm14, %v2110_v14, %v2108_v17  ;;  %vm2060_vm0 = vcmp.eq.f32.partialorder %v6145_v25, 0.0  ;;  %v2061_v63 = vand.u32 2147483648, %v6145_v25 }
 0x1c6   :  { %v2264_v47 = vand.u32 4294901760, %v2181_v0  ;;  %v3889_v57 = vadd.f32 -0.1, %v6271_v28  ;;  %v2172_v23 = vmax.f32 %v3888_v20, 0.0  ;;  %v2059_v40 = vsel %vm2058_vm15, %v6145_v25, %v2057_v6 }
 0x1c7   :  { %v6277_v7 = vsub.f32 %v2180_v42, %v2261_v37  ;;  %v6279_v18 = vsel %vm2060_vm0, %v2061_v63, %v2059_v40  ;;  %v2064_v62 = vmul.f32 %v6191_v8, %v6136_v21  ;;  %vm2065_vm11 = vcmp.eq.f32.partialorder %v6136_v21, inf }
 0x1c8   :  { %v6284_v17 = vpack.c.bf16 %v2264_v47, %v2261_v37  ;;  %v6286_v14 = vsub.f32 %v2181_v0, %v2264_v47  ;;  %v2173_v58 = vmax.f32 %v3889_v57, 0.0  ;;  %v2188_v9 = vmul.f32 %v2172_v23, %v2172_v23 }
 0x1c9   :  { %v2066_v29 = vsel %vm2065_vm11, %v6136_v21, %v2064_v62  ;;  %vm2067_vm12 = vcmp.eq.f32.partialorder %v6136_v21, 0.0  ;;  %v2068_v25 = vand.u32 2147483648, %v6136_v21  ;;  %v3882_v42 = vadd.f32 -0.1, %v6279_v18 }
 0x1ca   :  { %7066 = vst [vmem:[#allocation18_spill] sm:$0xff] %v6284_v17  ;;  %5025 = vmatpush3.bf16.msra.mxu0 %v6284_v17  ;;  %v2189_v20 = vmul.f32 %v2173_v58, %v2173_v58  ;;  %v2801_v8 = vand.u32 4294901760, %v2188_v9  ;;  %v2113_v6 = vmul.f32 %v6210_v30, %v6148_v1  ;;  %vm2114_vm13 = vcmp.eq.f32.partialorder %v6148_v1, inf }
 0x1cb   :  { %v7067_v0 = vmov 0.0|0.0   ;;  %v6297_v37 = vsel %vm2067_vm12, %v2068_v25, %v2066_v29  ;;  %v2166_v63 = vmax.f32 %v3882_v42, 0.0  ;;  %vm2116_vm14 = vcmp.eq.f32.partialorder %v6148_v1, 0.0 }
 0x1cc   :  { %5026 = vmatprep.subr.bf16.mxu0 %v7067_v0  ;;  %v2117_v21 = vand.u32 2147483648, %v6148_v1  ;;  %v2804_v47 = vand.u32 4294901760, %v2189_v20  ;;  %v6301_v57 = vsub.f32 %v2188_v9, %v2801_v8  ;;  %v3883_v58 = vadd.f32 -0.1, %v6297_v37 }
 0x1cd   :  { %v2115_v23 = vsel %vm2114_vm13, %v6148_v1, %v2113_v6  ;;  %v2182_v40 = vmul.f32 %v2166_v63, %v2166_v63  ;;  %v2120_v62 = vmul.f32 %v6196_v16, %v6140_v36  ;;  %vm2121_vm15 = vcmp.eq.f32.partialorder %v6140_v36, inf }
 0x1ce   :  { %v6305_v30 = vsel %vm2116_vm14, %v2117_v21, %v2115_v23  ;;  %v6310_v29 = vpack.c.bf16 %v2804_v47, %v2801_v8  ;;  %v6312_v25 = vsub.f32 %v2189_v20, %v2804_v47  ;;  %v2167_v42 = vmax.f32 %v3883_v58, 0.0 }
 0x1cf   :  { %vm2123_vm0 = vcmp.eq.f32.partialorder %v6140_v36, 0.0  ;;  %v2267_v9 = vand.u32 4294901760, %v2182_v40  ;;  %v2122_v3 = vsel %vm2121_vm15, %v6140_v36, %v2120_v62  ;;  %v2124_v1 = vand.u32 2147483648, %v6140_v36 }
 0x1d0   :  { %7068 = vst [vmem:[#allocation15_spill] sm:$0xff] %v6310_v29  ;;  %v3890_v6 = vadd.f32 -0.1, %v6305_v30  ;;  %5097 = vmatpush3.bf16.msra.mxu1 %v6310_v29  ;;  %v2183_v63 = vmul.f32 %v2167_v42, %v2167_v42  ;;  %v2071_v16 = vmul.f32 %v6223_v2, %v6162_v39  ;;  %vm2072_vm11 = vcmp.eq.f32.partialorder %v6162_v39, inf }
 0x1d1   :  { %vm2074_vm12 = vcmp.eq.f32.partialorder %v6162_v39, 0.0  ;;  %5098 = vmatprep.subr.bf16.mxu1 %v7067_v0  ;;  %v6324_v20 = vsub.f32 %v2182_v40, %v2267_v9  ;;  %v6326_v8 = vsel %vm2123_vm0, %v2124_v1, %v2122_v3  ;;  %v2075_v36 = vand.u32 2147483648, %v6162_v39 }
 0x1d2   :  { %v2174_v21 = vmax.f32 %v3890_v6, 0.0  ;;  %v2270_v47 = vand.u32 4294901760, %v2183_v63  ;;  %v3891_v58 = vadd.f32 -0.1, %v6326_v8  ;;  %v2073_v23 = vsel %vm2072_vm11, %v6162_v39, %v2071_v16 }
 0x1d3   :  { %v2078_v2 = vmul.f32 %v6213_v31, %v6150_v22  ;;  %v6333_v42 = vsel %vm2074_vm12, %v2075_v36, %v2073_v23  ;;  %vm2079_vm13 = vcmp.eq.f32.partialorder %v6150_v22, inf  ;;  %vm2081_vm14 = vcmp.eq.f32.partialorder %v6150_v22, 0.0 }
 0x1d4   :  { %v2190_v62 = vmul.f32 %v2174_v21, %v2174_v21  ;;  %v6337_v3 = vpack.c.bf16 %v2270_v47, %v2267_v9  ;;  %v6339_v40 = vsub.f32 %v2183_v63, %v2270_v47  ;;  %v2175_v1 = vmax.f32 %v3891_v58, 0.0 }
 0x1d5   :  { %v2080_v6 = vsel %vm2079_vm13, %v6150_v22, %v2078_v2  ;;  %v2082_v39 = vand.u32 2147483648, %v6150_v22  ;;  %v3884_v16 = vadd.f32 -0.1, %v6333_v42  ;;  %v2127_v31 = vmul.f32 %v6232_v48, %v6169_v5 }
 0x1d6   :  { %7069 = vst [vmem:[#allocation16_spill] sm:$0xff] %v6337_v3  ;;  %v2807_v33 = vand.u32 4294901760, %v2190_v62  ;;  %5028 = vmatpush3.bf16.msra.mxu0 %v6337_v3  ;;  %v2191_v21 = vmul.f32 %v2175_v1, %v2175_v1  ;;  %vm2128_vm15 = vcmp.eq.f32.partialorder %v6169_v5, inf  ;;  %vm2130_vm0 = vcmp.eq.f32.partialorder %v6169_v5, 0.0 }
 0x1d7   :  { %v2131_v9 = vand.u32 2147483648, %v6169_v5  ;;  %5029 = vmatprep.subr.bf16.mxu0 %v7067_v0  ;;  %v6355_v36 = vsel %vm2081_vm14, %v2082_v39, %v2080_v6  ;;  %v2168_v47 = vmax.f32 %v3884_v16, 0.0  ;;  %v2129_v48 = vsel %vm2128_vm15, %v6169_v5, %v2127_v31 }
 0x1d8   :  { %v6350_v63 = vsub.f32 %v2190_v62, %v2807_v33  ;;  %v2810_v58 = vand.u32 4294901760, %v2191_v21  ;;  %v3885_v23 = vadd.f32 -0.1, %v6355_v36  ;;  %v2134_v1 = vmul.f32 %v6219_v26, %v6155_v19 }
 0x1d9   :  { %v6359_v2 = vsel %vm2130_vm0, %v2131_v9, %v2129_v48  ;;  %v2184_v32 = vmul.f32 %v2168_v47, %v2168_v47  ;;  %vm2135_vm11 = vcmp.eq.f32.partialorder %v6155_v19, inf  ;;  %vm2137_vm12 = vcmp.eq.f32.partialorder %v6155_v19, 0.0 }
 0x1da   :  { %v2138_v22 = vand.u32 2147483648, %v6155_v19  ;;  %v6366_v62 = vpack.c.bf16 %v2810_v58, %v2807_v33  ;;  %v6368_v6 = vsub.f32 %v2191_v21, %v2810_v58  ;;  %v2169_v5 = vmax.f32 %v3885_v23, 0.0 }
 0x1db   :  { %v2136_v39 = vsel %vm2135_vm11, %v6155_v19, %v2134_v1  ;;  %v2273_v16 = vand.u32 4294901760, %v2184_v32  ;;  %v3892_v9 = vadd.f32 -0.1, %v6359_v2  ;;  %v6958_v26 = vand.u32 4294901760, %v6221_v27 }
 0x1dc   :  { %7070 = vst [vmem:[#allocation19_spill] sm:$0xff] %v6366_v62  ;;  %v6371_v31 = vsel %vm2137_vm12, %v2138_v22, %v2136_v39  ;;  %5100 = vmatpush3.bf16.msra.mxu1 %v6366_v62  ;;  %v2185_v47 = vmul.f32 %v2169_v5, %v2169_v5  ;;  %v6968_v33 = vand.u32 4294901760, %v6236_v11  ;;  %v6971_v21 = vand.u32 4294901760, %v6246_v12 }
 0x1dd   :  { %v3893_v48 = vadd.f32 -0.1, %v6371_v31  ;;  %5101 = vmatprep.subr.bf16.mxu1 %v7067_v0  ;;  %v6380_v58 = vsub.f32 %v2184_v32, %v2273_v16  ;;  %v2176_v19 = vmax.f32 %v3892_v9, 0.0  ;;  %v2341_v23 = vsub.f32 %v6221_v27, %v6958_v26 }
 0x1de   :  { %v6972_v1 = vand.u32 4294901760, %v6257_v41  ;;  %v2276_v22 = vand.u32 4294901760, %v2185_v47  ;;  %v2348_v5 = vsub.f32 %v6236_v11, %v6968_v33  ;;  %v2881_v60 = vsub.f32 %v6246_v12, %v6971_v21 }
 0x1df   :  { %v2177_v39 = vmax.f32 %v3893_v48, 0.0  ;;  %v2192_v53 = vmul.f32 %v2176_v19, %v2176_v19  ;;  %v2342_v32 = vand.u32 4294901760, %v2341_v23  ;;  %v6978_v26 = vand.u32 4294901760, %v6277_v7 }
 0x1e0   :  { %v2888_v9 = vsub.f32 %v6257_v41, %v6972_v1  ;;  %v6396_v43 = vpack.c.bf16 %v2276_v22, %v2273_v16  ;;  %v6398_v59 = vsub.f32 %v2185_v47, %v2276_v22  ;;  %v2349_v61 = vand.u32 4294901760, %v2348_v5 }
 0x1e1   :  { %v2193_v48 = vmul.f32 %v2177_v39, %v2177_v39  ;;  %v2813_v38 = vand.u32 4294901760, %v2192_v53  ;;  %v2882_v33 = vand.u32 4294901760, %v2881_v60  ;;  %v2355_v19 = vsub.f32 %v6277_v7, %v6978_v26 }
 0x1e2   :  { %7071 = vst [vmem:[#allocation20_spill] sm:$0xff] %v6396_v43  ;;  %v2889_v24 = vand.u32 4294901760, %v2888_v9  ;;  %5031 = vmatpush3.bf16.msra.mxu0 %v6396_v43  ;;  %v5033_v21 = vpack.c.bf16 %v2349_v61, %v2342_v32  ;;  %v6977_v1 = vand.u32 4294901760, %v6286_v14  ;;  %v6976_v16 = vand.u32 4294901760, %v6301_v57 }
 0x1e3   :  { %v2816_v23 = vand.u32 4294901760, %v2193_v48  ;;  %v6406_v50 = vsub.f32 %v2192_v53, %v2813_v38  ;;  %5032 = vmatprep.subr.bf16.mxu0 %v7067_v0  ;;  %v2356_v22 = vand.u32 4294901760, %v2355_v19  ;;  %v6975_v60 = vand.u32 4294901760, %v6312_v25 }
 0x1e4   :  { %v5105_v47 = vpack.c.bf16 %v2889_v24, %v2882_v33  ;;  %v2362_v61 = vsub.f32 %v6286_v14, %v6977_v1  ;;  %v2895_v32 = vsub.f32 %v6301_v57, %v6976_v16  ;;  %v7073_v53 = vand.u32 4294901760, %v6082_v45 }
 0x1e5   :  { %v6410_v39 = vpack.c.bf16 %v2816_v23, %v2813_v38  ;;  %v6412_v5 = vsub.f32 %v2193_v48, %v2816_v23  ;;  %v2902_v24 = vsub.f32 %v6312_v25, %v6975_v60  ;;  %v2368_v38 = vand.u32 4294901760, %v6324_v20 }
 0x1e6   :  { %4593 = vmatmul.mubr.f32.vlgmr.msra.gmra.mrb[8].mxu0 %v7073_v53  ;;  %v2375_v33 = vand.u32 4294901760, %v6339_v40  ;;  %v2908_v9 = vand.u32 4294901760, %v6350_v63  ;;  %v2363_v48 = vand.u32 4294901760, %v2362_v61  ;;  %v2896_v19 = vand.u32 4294901760, %v2895_v32 }
 0x1e7   :  { %7072 = vst [vmem:[#allocation21_spill] sm:$0xff] %v6410_v39  ;;  %5103 = vmatpush3.bf16.msra.mxu1 %v6410_v39  ;;  %5034 = vmatpush3.bf16.msra.mxu0 %v5033_v21  ;;  %v2915_v23 = vand.u32 4294901760, %v6368_v6  ;;  %v2382_v45 = vand.u32 4294901760, %v6380_v58  ;;  %v2903_v53 = vand.u32 4294901760, %v2902_v24  ;;  %v2369_v60 = vsub.f32 %v6324_v20, %v2368_v38 }
 0x1e8   :  { %5104 = vmatprep.subr.bf16.mxu1 %v7067_v0  ;;  %5035 = vmatprep.subr.bf16.mxu0 %v7067_v0  ;;  %v2376_v16 = vsub.f32 %v6339_v40, %v2375_v33  ;;  %v2909_v1 = vsub.f32 %v6350_v63, %v2908_v9  ;;  %v5036_v26 = vpack.c.bf16 %v2363_v48, %v2356_v22  ;;  %v2389_v32 = vand.u32 4294901760, %v6398_v59 }
 0x1e9   :  { %v2916_v21 = vsub.f32 %v6368_v6, %v2915_v23  ;;  %v2383_v61 = vsub.f32 %v6380_v58, %v2382_v45  ;;  %v7074_v39 = vmov 0.0   ;;  %v7075_v43 = vand.u32 4294901760, %v6091_v10 }
 0x1ea   :  { %4611 = vmatprep.mubr.msk.f32.mxu0 %vm5362_vm2, %v7074_v39  ;;  %v5108_v24 = vpack.c.bf16 %v2903_v53, %v2896_v19  ;;  %v2370_v62 = vand.u32 4294901760, %v2369_v60  ;;  %v2377_v3 = vand.u32 4294901760, %v2376_v16  ;;  %v2910_v29 = vand.u32 4294901760, %v2909_v1 }
 0x1eb   :  { %4707 = vmatmul.mubr.f32.vlgmr.msra.gmra.mrb[8].mxu1 %v7075_v43  ;;  %5037 = vmatpush3.bf16.msra.mxu0 %v5036_v26  ;;  %v2917_v17 = vand.u32 4294901760, %v2916_v21  ;;  %v2384_v22 = vand.u32 4294901760, %v2383_v61  ;;  %v2390_v48 = vsub.f32 %v6398_v59, %v2389_v32  ;;  %v2922_v4 = vand.u32 4294901760, %v6406_v50 }
 0x1ec   :  { %5106 = vmatpush3.bf16.msra.mxu1 %v5105_v47  ;;  %5038 = vmatprep.subr.bf16.mxu0 %v7067_v0  ;;  %v5039_v56 = vpack.c.bf16 %v2377_v3, %v2370_v62  ;;  %v2929_v10 = vand.u32 4294901760, %v6412_v5  ;;  %v5045_v43 = vpack.c.bf16 %v6236_v11, %v6221_v27  ;;  %v5117_v1 = vpack.c.bf16 %v6257_v41, %v6246_v12 }
 0x1ed   :  { %5107 = vmatprep.subr.bf16.mxu1 %v7067_v0  ;;  %v5111_v26 = vpack.c.bf16 %v2917_v17, %v2910_v29  ;;  %v2391_v16 = vand.u32 4294901760, %v2390_v48  ;;  %v2923_v47 = vsub.f32 %v6406_v50, %v2922_v4  ;;  %4725 = vmatprep.mubr.msk.f32.mxu1 %vm5362_vm2, %v7074_v39  ;;  %v5048_v60 = vpack.c.bf16 %v6286_v14, %v6277_v7 }
 0x1ee   :  { %v2930_v3 = vsub.f32 %v6412_v5, %v2929_v10  ;;  %v5120_v62 = vpack.c.bf16 %v6312_v25, %v6301_v57  ;;  %v5051_v19 = vpack.c.bf16 %v6339_v40, %v6324_v20  ;;  %v5123_v17 = vpack.c.bf16 %v6368_v6, %v6350_v63 }
 0x1ef   :  { %5040 = vmatpush3.bf16.msra.mxu0 %v5039_v56  ;;  %v5042_v29 = vpack.c.bf16 %v2391_v16, %v2384_v22  ;;  %v2924_v53 = vand.u32 4294901760, %v2923_v47  ;;  %v5054_v21 = vpack.c.bf16 %v6398_v59, %v6380_v58  ;;  %v5126_v61 = vpack.c.bf16 %v6412_v5, %v6406_v50 }
 0x1f0   :  { %5109 = vmatpush3.bf16.msra.mxu1 %v5108_v24  ;;  %5041 = vmatprep.subr.bf16.mxu0 %v7067_v0  ;;  %v2931_v48 = vand.u32 4294901760, %v2930_v3  ;;  %v7076_v20 = vand.u32 4294901760, %v6221_v27  ;;  %v7077_v40 = vand.u32 4294901760, %v6236_v11  ;;  %v7078_v56 = vand.u32 4294901760, %v6246_v12  ;;  %v7108_v3 = vld [vmem:[#allocation21_spill] sm:$0xff] }
 0x1f1   :  { %5110 = vmatprep.subr.bf16.mxu1 %v7067_v0  ;;  %v7079_v6 = vand.u32 4294901760, %v6257_v41  ;;  %v7080_v59 = vand.u32 4294901760, %v6277_v7  ;;  %v7081_v50 = vand.u32 4294901760, %v6286_v14  ;;  %v7082_v5 = vand.u32 4294901760, %v6301_v57 }
 0x1f2   :  { %v6474_v63 = vpack.c.bf16 %v7077_v40, %v7076_v20  ;;  %v7083_v27 = vand.u32 4294901760, %v6312_v25  ;;  %v6494_v11 = vpack.c.bf16 %v2375_v33, %v2368_v38  ;;  %v6496_v16 = vpack.c.bf16 %v2915_v23, %v2908_v9  ;;  %v7100_v23 = vld [vmem:[#allocation14_spill] sm:$0xff] }
 0x1f3   :  { %v6480_v24 = vpack.c.bf16 %v7079_v6, %v7078_v56  ;;  %v6486_v58 = vpack.c.bf16 %v7081_v50, %v7080_v59  ;;  %v6498_v12 = vpack.c.bf16 %v2389_v32, %v2382_v45  ;;  %v5114_v41 = vpack.c.bf16 %v2931_v48, %v2924_v53  ;;  %5043 = vmatpush3.bf16.msra.mxu0 %v5042_v29  ;;  %v7101_v45 = vld [vmem:[#allocation17_spill] sm:$0xff]  ;;  %v7102_v32 = vld [vmem:[#allocation18_spill] sm:$0xff] }
 0x1f4   :  { %v6492_v22 = vpack.c.bf16 %v7083_v27, %v7082_v5  ;;  %v6500_v47 = vpack.c.bf16 %v2929_v10, %v2922_v4  ;;  %vm2194_vm13 = vcmp.gt.f32.partialorder %v6178_v35, 0.1  ;;  %vm2195_vm14 = vcmp.gt.f32.partialorder %v6186_v44, 0.1  ;;  %5112 = vmatpush3.bf16.msra.mxu1 %v5111_v26  ;;  %5044 = vmatprep.subr.bf16.mxu0 %v7067_v0  ;;  %v7103_v10 = vld [vmem:[#allocation15_spill] sm:$0xff]  ;;  %v7106_v26 = vld [vmem:[#allocation20_spill] sm:$0xff] }
 0x1f5   :  { %vm6504_vm15 = vmpackc.low %vm2195_vm14, %vm2194_vm13  ;;  %vm2202_vm0 = vcmp.gt.f32.partialorder %v6198_v54, 0.1  ;;  %vm2203_vm11 = vcmp.gt.f32.partialorder %v6205_v13, 0.1  ;;  %5113 = vmatprep.subr.bf16.mxu1 %v7067_v0  ;;  %vm2196_vm1 = vcmp.gt.f32.partialorder %v6227_v49, 0.1 }
 0x1f6   :  { %vm6512_vm12 = vmpackc.low %vm2203_vm11, %vm2202_vm0  ;;  %vm2197_vm10 = vcmp.gt.f32.partialorder %v6240_v15, 0.1  ;;  %vm2204_vm13 = vcmp.gt.f32.partialorder %v6262_v52, 0.1  ;;  %vm2205_vm9 = vcmp.gt.f32.partialorder %v6271_v28, 0.1  ;;  %4612 = vmatmul.mubr.f32.vlgmr.msra.gmra.mrb[8].mxu0 %v6045_v46 }
 0x1f7   :  { %vm6519_vm14 = vmpackc.low %vm2197_vm10, %vm2196_vm1  ;;  %vm2198_vm8 = vcmp.gt.f32.partialorder %v6279_v18, 0.1  ;;  %vm2199_vm7 = vcmp.gt.f32.partialorder %v6297_v37, 0.1  ;;  %vm2206_vm11 = vcmp.gt.f32.partialorder %v6305_v30, 0.1  ;;  %5046 = vmatpush3.bf16.msra.mxu0 %v5045_v43  ;;  %4630 = vmatprep.mubr.msk.f32.mxu0 %vm5362_vm2, %v7074_v39 }
 0x1f8   :  { %vm6527_vm0 = vmpackc.low %vm2205_vm9, %vm2204_vm13  ;;  %vm2207_vm5 = vcmp.gt.f32.partialorder %v6326_v8, 0.1  ;;  %vm2200_vm1 = vcmp.gt.f32.partialorder %v6333_v42, 0.1  ;;  %5115 = vmatpush3.bf16.msra.mxu1 %v5114_v41  ;;  %vm2201_vm4 = vcmp.gt.f32.partialorder %v6355_v36, 0.1  ;;  %5047 = vmatprep.subr.bf16.mxu0 %v7067_v0 }
 0x1f9   :  { %vm6534_vm10 = vmpackc.low %vm2199_vm7, %vm2198_vm8  ;;  %vm2208_vm3 = vcmp.gt.f32.partialorder %v6359_v2, 0.1  ;;  %vm2209_vm9 = vcmp.gt.f32.partialorder %v6371_v31, 0.1  ;;  %5116 = vmatprep.subr.bf16.mxu1 %v7067_v0  ;;  %v7104_v43 = vld [vmem:[#allocation16_spill] sm:$0xff]  ;;  %v6687_v4 = vmov 0.0  }
 0x1fa   :  { %vm6543_vm13 = vmpackc.low %vm2207_vm5, %vm2206_vm11  ;;  %v6689_v14 = vmov 0.0  }
 0x1fb   :  { %vm6549_vm7 = vmpackc.low %vm2201_vm4, %vm2200_vm1  ;;  %4726 = vmatmul.mubr.f32.vlgmr.msra.gmra.mrb[8].mxu1 %v6050_v51  ;;  %5049 = vmatpush3.bf16.msra.mxu0 %v5048_v60  ;;  %v7107_v60 = vand.u32 4294901760, %v6057_v34 }
 0x1fc   :  { %vm6554_vm8 = vmpackc.low %vm2209_vm9, %vm2208_vm3  ;;  %5118 = vmatpush3.bf16.msra.mxu1 %v5117_v1  ;;  %5050 = vmatprep.subr.bf16.mxu0 %v7067_v0  ;;  %v7105_v1 = vld [vmem:[#allocation19_spill] sm:$0xff] }
 0x1fd   :  { %5119 = vmatprep.subr.bf16.mxu1 %v7067_v0  ;;  %4744 = vmatprep.mubr.msk.f32.mxu1 %vm5362_vm2, %v7074_v39 }
 0x1ff   :  { %5052 = vmatpush3.bf16.msra.mxu0 %v5051_v19 }
 0x200   :  { %5121 = vmatpush3.bf16.msra.mxu1 %v5120_v62  ;;  %5053 = vmatprep.subr.bf16.mxu0 %v7067_v0  ;;  %v7109_v62 = vand.u32 4294901760, %v7100_v23 }
 0x201   :  { %5122 = vmatprep.subr.bf16.mxu1 %v7067_v0 }
 0x203   :  { %5055 = vmatpush3.bf16.msra.mxu0 %v5054_v21 }
 0x204   :  { %5124 = vmatpush3.bf16.msra.mxu1 %v5123_v17  ;;  %5056 = vmatprep.subr.bf16.mxu0 %v7067_v0  ;;  %v7110_v17 = vld [vmem:[#allocation11_spill] sm:$0xff] }
 0x205   :  { %5125 = vmatprep.subr.bf16.mxu1 %v7067_v0 }
 0x206   :  { %4631 = vmatmul.mubr.f32.vlgmr.msra.gmra.mrb[8].mxu0 %v6057_v34  ;;  %v5364_v34 = vmov 1.0|1.0  }
 0x207   :  { %5058 = vmatpush3.bf16.msra.mxu0 %v6234_v55  ;;  %4649 = vmatprep.mubr.msk.f32.mxu0 %vm5362_vm2, %v7074_v39 }
 0x208   :  { %5127 = vmatpush3.bf16.msra.mxu1 %v5126_v61  ;;  %5059 = vmatprep.subr.bf16.mxu0 %v7067_v0  ;;  %v7111_v61 = vld [vmem:[#allocation10_spill] sm:$0xff] }
 0x209   :  { %5128 = vmatprep.subr.bf16.mxu1 %v7067_v0 }
 0x20b   :  { %4745 = vmatmul.mubr.f32.vlgmr.msra.gmra.mrb[8].mxu1 %v7100_v23  ;;  %5061 = vmatpush3.bf16.msra.mxu0 %v7102_v32 }
 0x20c   :  { %5130 = vmatpush3.bf16.msra.mxu1 %v7101_v45  ;;  %5062 = vmatprep.subr.bf16.mxu0 %v7067_v0 }
 0x20d   :  { %5131 = vmatprep.subr.bf16.mxu1 %v7067_v0  ;;  %4763 = vmatprep.mubr.msk.f32.mxu1 %vm5362_vm2, %v7074_v39 }
 0x20f   :  { %5064 = vmatpush3.bf16.msra.mxu0 %v7104_v43 }
 0x210   :  { %5133 = vmatpush3.bf16.msra.mxu1 %v7103_v10  ;;  %5065 = vmatprep.subr.bf16.mxu0 %v7067_v0 }
 0x211   :  { %5134 = vmatprep.subr.bf16.mxu1 %v7067_v0 }
 0x213   :  { %5067 = vmatpush3.bf16.msra.mxu0 %v7106_v26 }
 0x214   :  { %5136 = vmatpush3.bf16.msra.mxu1 %v7105_v1  ;;  %5068 = vmatprep.subr.bf16.mxu0 %v7067_v0 }
 0x215   :  { %5137 = vmatprep.subr.bf16.mxu1 %v7067_v0 }
 0x216   :  { %4650 = vmatmul.mubr.f32.vlgmr.msra.gmra.mrb[8].mxu0 %v7107_v60 }
 0x217   :  { %5070 = vmatpush3.bf16.msra.mxu0 %v6474_v63  ;;  %4668 = vmatprep.mubr.msk.f32.mxu0 %vm5362_vm2, %v7074_v39 }
 0x218   :  { %5139 = vmatpush3.bf16.msra.mxu1 %v7108_v3  ;;  %5071 = vmatprep.subr.bf16.mxu0 %v7067_v0 }
 0x219   :  { %5140 = vmatprep.subr.bf16.mxu1 %v7067_v0 }
 0x21b   :  { %4764 = vmatmul.mubr.f32.vlgmr.msra.gmra.mrb[8].mxu1 %v7109_v62  ;;  %5073 = vmatpush3.bf16.msra.mxu0 %v6486_v58 }
 0x21c   :  { %5142 = vmatpush3.bf16.msra.mxu1 %v6480_v24  ;;  %5074 = vmatprep.subr.bf16.mxu0 %v7067_v0 }
 0x21d   :  { %5143 = vmatprep.subr.bf16.mxu1 %v7067_v0  ;;  %4782 = vmatprep.mubr.msk.f32.mxu1 %vm5362_vm2, %v7074_v39 }
 0x21f   :  { %5076 = vmatpush3.bf16.msra.mxu0 %v6494_v11 }
 0x220   :  { %5145 = vmatpush3.bf16.msra.mxu1 %v6492_v22  ;;  %5077 = vmatprep.subr.bf16.mxu0 %v7067_v0 }
 0x221   :  { %5146 = vmatprep.subr.bf16.mxu1 %v7067_v0 }
 0x223   :  { %5079 = vmatpush3.bf16.msra.mxu0 %v6498_v12 }
 0x224   :  { %5148 = vmatpush3.bf16.msra.mxu1 %v6496_v16  ;;  %5080 = vmatprep.subr.bf16.mxu0 %v7067_v0 }
 0x225   :  { %5149 = vmatprep.subr.bf16.mxu1 %v7067_v0 }
 0x226   :  { %4669 = vmatmul.mubr.f32.vlgmr.msra.gmra.mrb[8].mxu0 %v6045_v46 }
 0x227   :  { %5082 = vmatpush3.bf16.msra.mxu0 %v6234_v55  ;;  %4687 = vmatprep.mubr.msk.f32.mxu0 %vm5362_vm2, %v7074_v39  ;;  %v5328_v55 = vld [vmem:[%s6896_s1 + $0x1] sm:$0x1] }
 0x228   :  { %5151 = vmatpush3.bf16.msra.mxu1 %v6500_v47  ;;  %5083 = vmatprep.subr.bf16.mxu0 %v7067_v0 }
 0x229   :  { %5152 = vmatprep.subr.bf16.mxu1 %v7067_v0 }
 0x22b   :  { %4783 = vmatmul.mubr.f32.vlgmr.msra.gmra.mrb[8].mxu1 %v6050_v51  ;;  %5085 = vmatpush3.bf16.msra.mxu0 %v7102_v32 }
 0x22c   :  { %5154 = vmatpush3.bf16.msra.mxu1 %v7101_v45  ;;  %5086 = vmatprep.subr.bf16.mxu0 %v7067_v0 }
 0x22d   :  { %5155 = vmatprep.subr.bf16.mxu1 %v7067_v0  ;;  %4801 = vmatprep.mubr.msk.f32.mxu1 %vm5362_vm2, %v7074_v39 }
 0x22f   :  { %5088 = vmatpush3.bf16.msra.mxu0 %v7104_v43 }
 0x230   :  { %5157 = vmatpush3.bf16.msra.mxu1 %v7103_v10  ;;  %5089 = vmatprep.subr.bf16.mxu0 %v7067_v0 }
 0x231   :  { %5158 = vmatprep.subr.bf16.mxu1 %v7067_v0 }
 0x233   :  { %5091 = vmatpush3.bf16.msra.mxu0 %v7106_v26 }
 0x234   :  { %5160 = vmatpush3.bf16.msra.mxu1 %v7105_v1  ;;  %4804 = vmatprep.subr.bf16.mxu0 %v7074_v39 }
 0x235   :  { %5161 = vmatprep.subr.bf16.mxu1 %v7067_v0  ;;  %v3332_v0 = vunpack.c.l.s8.bf16 %v5328_v55 }
 0x236   :  { %4688 = vmatmul.mubr.f32.vlgmr.msra.gmra.mrb[8].mxu0 %v6045_v46  ;;  %v5327_v46 = vld [vmem:[%s6896_s1] sm:$0x1]  ;;  %s6691_s1 = smov 0  }
 0x237   :  { %4805 = vmatpush3.bf16.msk.msra.mxu0 %vm6504_vm15, %v5364_v34  ;;  %4812 = vmatprep.mubr.msk.bf16.mxu0 %vm5362_vm2, %v7074_v39 }
 0x238   :  { %5163 = vmatpush3.bf16.msra.mxu1 %v7108_v3  ;;  %4806 = vmatprep.subr.bf16.mxu0 %v7074_v39 }
 0x239   :  { %4816 = vmatprep.subr.bf16.mxu1 %v7074_v39 }
 0x23b   :  { %4802 = vmatmul.mubr.f32.vlgmr.msra.gmra.mrb[8].mxu1 %v6050_v51  ;;  %4807 = vmatpush3.bf16.msk.msra.mxu0 %vm6519_vm14, %v5364_v34  ;;  %v3331_v51 = vunpack.c.l.s8.bf16 %v5327_v46 }
 0x23c   :  { %4817 = vmatpush3.bf16.msk.msra.mxu1 %vm6512_vm12, %v5364_v34  ;;  %4808 = vmatprep.subr.bf16.mxu0 %v7074_v39 }
 0x23d   :  { %4818 = vmatprep.subr.bf16.mxu1 %v7074_v39  ;;  %4824 = vmatprep.mubr.msk.bf16.mxu1 %vm5362_vm2, %v7074_v39  ;;  %vm3421_vm2 = vcmask 519168  }
 0x23f   :  { %4809 = vmatpush3.bf16.msk.msra.mxu0 %vm6534_vm10, %v5364_v34 }
 0x240   :  { %4819 = vmatpush3.bf16.msk.msra.mxu1 %vm6527_vm0, %v5364_v34  ;;  %4810 = vmatprep.subr.bf16.mxu0 %v7074_v39 }
 0x241   :  { %4820 = vmatprep.subr.bf16.mxu1 %v7074_v39 }
 0x243   :  { %4811 = vmatpush3.bf16.msk.msra.mxu0 %vm6549_vm7, %v5364_v34 }
 0x244   :  { %4821 = vmatpush3.bf16.msk.msra.mxu1 %vm6543_vm13, %v5364_v34 }
 0x245   :  { %4822 = vmatprep.subr.bf16.mxu1 %v7074_v39 }
 0x246   :  { %4813 = vmatmul.mubr.msk.bf16.vlgmr.msra.gmra.mrb[12].mxu0 %vm2250_vm6, %v3331_v51 }
 0x248   :  { %4823 = vmatpush3.bf16.msk.msra.mxu1 %vm6554_vm8, %v5364_v34 }
 0x24b   :  { %4825 = vmatmul.mubr.msk.bf16.vlgmr.msra.gmra.mrb[12].mxu1 %vm2250_vm6, %v3332_v0 }
 0x309   :  { %v2787_v19 = vpop.f32.mrb[8].mxu0 }
 0x30a   :  { %v3419_v29 = vmul.f32 %v2787_v19, %v7110_v17  ;;  %v4689_v53 = vpop.f32.mrb[9].mxu0 }
 0x30c   :  { %v3422_v21 = vsel %vm3421_vm2, %v3419_v29, 0.0 }
 0x30d   :  { %3423 = vadd.xlane.f32.xlu0 %v3422_v21 }
 0x30e   :  { %v3327_v39 = vpop.f32.mrb[8].mxu1 }
 0x30f   :  { %v3420_v48 = vmul.f32 %v3327_v39, %v7111_v61  ;;  %v4803_v20 = vpop.f32.mrb[9].mxu1 }
 0x311   :  { %v3425_v40 = vsel %vm3421_vm2, %v3420_v48, 0.0 }
 0x312   :  { %3426 = vadd.xlane.f32.xlu1 %v3425_v40 }
 0x319   :  { %v3370_v63 = vpop.f32.mrb[12].mxu0 }
 0x31a   :  { %v3428_v56 = vmul.f32 %v3370_v63, %v7110_v17  ;;  %v4814_v6 = vpop.f32.mrb[13].mxu0 }
 0x31b   :  { %v3373_v24 = vpop.f32.mrb[14].mxu0 }
 0x31c   :  { %v4815_v59 = vpop.f32.mrb[15].mxu0  ;;  %v3430_v50 = vsel %vm3421_vm2, %v3428_v56, 0.0 }
 0x31d   :  { %3431 = vadd.xlane.f32.xlu0 %v3430_v50 }
 0x31e   :  { %v3413_v58 = vpop.f32.mrb[12].mxu1 }
 0x31f   :  { %v3429_v5 = vmul.f32 %v3413_v58, %v7111_v61  ;;  %v4826_v27 = vpop.f32.mrb[13].mxu1 }
 0x320   :  { %v3416_v22 = vpop.f32.mrb[14].mxu1 }
 0x321   :  { %v4827_v11 = vpop.f32.mrb[15].mxu1  ;;  %v3433_v16 = vsel %vm3421_vm2, %v3429_v5, 0.0 }
 0x322   :  { %3434 = vadd.xlane.f32.xlu1 %v3433_v16 }
 0x39a   :  { %v6679_v12 = vpop.xlane.xlu0 %3423 }
 0x39f   :  { %v6681_v41 = vpop.xlane.xlu1 %3426 }
 0x3aa   :  { %v6683_v47 = vpop.xlane.xlu0 %3431 }
 0x3af   :  { %v6685_v7 = vpop.xlane.xlu1 %3434 }
 0x3b0 LB: > { %v3446_v57 = vstv %s5359_s1  ;;  %v7112_v25 = vld [vmem:[#allocation3_spill] sm:$0xff]  ;;  %v7113_v38 = vld [vmem:[#allocation10_spill] sm:$0xff]  ;;  %vm7118_vm10 = vcmask 130112   ;;  %vm7120_vm8 = vcmask 195712   ;;  %s3443_s1 = sadd.s32 1, %s5359_s1   ;;  %s5359_s1 = sphi %s6691_s1, %s3443_s1   ;;  %v5355_v14 = vphi %v6689_v14, %v7153_v14   ;;  %v5351_v4 = vphi %v6687_v4, %v7152_v4  }
 0x3b1   : > { %vm3447_vm3 = vcmp.eq.s32.totalorder %v7112_v25, %v3446_v57  ;;  %v7114_v9 = vld [vmem:[#allocation11_spill] sm:$0xff]  ;;  %vm7119_vm7 = vmmov %vm7118_vm10  ;;  %p3440_p0 = scmp.ge.s32.totalorder %s3443_s1, 4  }
 0x3b2   : > { %v3451_v33 = vsel %vm3447_vm3, %v7113_v38, 0.0  ;;  %v3450_v23 = vsel %vm3447_vm3, %v7114_v9, 0.0 }
 0x3b3   : > { %v3459_v45 = vsel %vm3421_vm2, %v3451_v33, -inf  ;;  %v3452_v32 = vsel %vm3421_vm2, %v3450_v23, -inf }
 0x3b4   : > { %v3460_v10 = vrot.slane %v3459_v45, 4  ;;  %v3453_v43 = vrot.slane %v3452_v32, 4 }
 0x3b6   : > { %v3461_v1 = vmax.f32 %v3459_v45, %v3460_v10  ;;  %v3454_v26 = vmax.f32 %v3452_v32, %v3453_v43 }
 0x3b8   : > { %v3462_v60 = vrot.slane %v3461_v1, 2  ;;  %v3455_v3 = vrot.slane %v3454_v26, 2 }
 0x3ba   : > { %v3463_v62 = vmax.f32 %v3461_v1, %v3462_v60  ;;  %v3456_v34 = vmax.f32 %v3454_v26, %v3455_v3 }
 0x3bc   : > { %v3464_v46 = vrot.slane %v3463_v62, 1  ;;  %v3457_v51 = vrot.slane %v3456_v34, 1 }
 0x3be   : > { %v6710_v55 = vmax.f32 %v3463_v62, %v3464_v46  ;;  %v6712_v0 = vmax.f32 %v3456_v34, %v3457_v51  ;;  %v5365_v34 = vmov 0  }
 0x3c0   : > { %vm3467_vm4 = vcmp.gt.f32.partialorder %v6710_v55, 0.5  ;;  %vm3466_vm5 = vcmp.gt.f32.partialorder %v6712_v0, 0.5 }
 0x3c1   : > { %v3482_v19 = vsel %vm3467_vm4, 1e+30, %v6262_v52  ;;  %v3480_v17 = vsel %vm3467_vm4, 1e+30, %v6198_v54  ;;  %v3481_v29 = vsel %vm3467_vm4, 1e+30, %v6205_v13 }
 0x3c2   : > { %v3518_v53 = vsel %vm2250_vm6, %v3482_v19, inf  ;;  %v3512_v21 = vsel %vm2250_vm6, %v3480_v17, inf  ;;  %v3472_v39 = vsel %vm3466_vm5, 1e+30, %v6178_v35  ;;  %v3515_v61 = vsel %vm2250_vm6, %v3481_v29, inf }
 0x3c3   : > { %3519 = vmin.xlane.f32.xlu1 %v3518_v53  ;;  %3513 = vmin.xlane.f32.xlu0 %v3512_v21  ;;  %v3488_v48 = vsel %vm2250_vm6, %v3472_v39, inf  ;;  %v3473_v20 = vsel %vm3466_vm5, 1e+30, %v6186_v44  ;;  %v3483_v40 = vsel %vm3467_vm4, 1e+30, %v6271_v28  ;;  %v7115_v39 = vld [vmem:[#allocation5_spill] sm:$0xff] }
 0x3c4   : > { %v3491_v63 = vsel %vm2250_vm6, %v3473_v20, inf  ;;  %v3521_v56 = vsel %vm2250_vm6, %v3483_v40, inf  ;;  %v3474_v6 = vsel %vm3466_vm5, 1e+30, %v6227_v49  ;;  %v3484_v24 = vsel %vm3467_vm4, 1e+30, %v6305_v30 }
 0x3c5   : > { %v3494_v59 = vsel %vm2250_vm6, %v3474_v6, inf  ;;  %v3524_v50 = vsel %vm2250_vm6, %v3484_v24, inf  ;;  %v3475_v58 = vsel %vm3466_vm5, 1e+30, %v6240_v15  ;;  %v3485_v5 = vsel %vm3467_vm4, 1e+30, %v6326_v8 }
 0x3c6   : > { %v3497_v27 = vsel %vm2250_vm6, %v3475_v58, inf  ;;  %v3527_v22 = vsel %vm2250_vm6, %v3485_v5, inf  ;;  %v3476_v11 = vsel %vm3466_vm5, 1e+30, %v6279_v18  ;;  %v3486_v16 = vsel %vm3467_vm4, 1e+30, %v6359_v2 }
 0x3c7   : > { %3516 = vmin.xlane.f32.xlu0 %v3515_v61  ;;  %3489 = vmin.xlane.f32.xlu1 %v3488_v48  ;;  %v3500_v25 = vsel %vm2250_vm6, %v3476_v11, inf  ;;  %v3530_v38 = vsel %vm2250_vm6, %v3486_v16, inf  ;;  %v3477_v33 = vsel %vm3466_vm5, 1e+30, %v6297_v37  ;;  %v3487_v9 = vsel %vm3467_vm4, 1e+30, %v6371_v31 }
 0x3c8   : > { %v3503_v23 = vsel %vm2250_vm6, %v3477_v33, inf  ;;  %v3533_v45 = vsel %vm2250_vm6, %v3487_v9, inf  ;;  %v3478_v32 = vsel %vm3466_vm5, 1e+30, %v6333_v42  ;;  %v3479_v10 = vsel %vm3466_vm5, 1e+30, %v6355_v36 }
 0x3c9   : > { %v3506_v43 = vsel %vm2250_vm6, %v3478_v32, inf  ;;  %v3509_v1 = vsel %vm2250_vm6, %v3479_v10, inf  ;;  %v7116_v20 = vld [vmem:[#allocation2_spill] sm:$0xff] }
 0x3ca   : > { %v7117_v24 = vld [vmem:[#allocation6_spill] sm:$0xff] }
 0x3cb   : > { %3492 = vmin.xlane.f32.xlu0 %v3491_v63  ;;  %3522 = vmin.xlane.f32.xlu1 %v3521_v56  ;;  %v7157_v42 = vld [vmem:[#allocation2_spill] sm:$0xff] (%p3440_p0) }
 0x3cf   : > { %3495 = vmin.xlane.f32.xlu0 %v3494_v59  ;;  %3525 = vmin.xlane.f32.xlu1 %v3524_v50 }
 0x3d3   : > { %3498 = vmin.xlane.f32.xlu0 %v3497_v27  ;;  %3528 = vmin.xlane.f32.xlu1 %v3527_v22 }
 0x3d7   : > { %3501 = vmin.xlane.f32.xlu0 %v3500_v25  ;;  %3531 = vmin.xlane.f32.xlu1 %v3530_v38 }
 0x3db   : > { %3504 = vmin.xlane.f32.xlu0 %v3503_v23  ;;  %3534 = vmin.xlane.f32.xlu1 %v3533_v45 }
 0x3df   : > { %3507 = vmin.xlane.f32.xlu0 %v3506_v43  ;;  %3510 = vmin.xlane.f32.xlu1 %v3509_v1 }
 0x450   : > { %v3520_v26 = vpop.xlane.xlu1 %3519  ;;  %v3514_v60 = vpop.xlane.xlu0 %3513 }
 0x451   : > { %vm3544_vm15 = vcmp.lt.f32.partialorder %v3514_v60, 1.0  ;;  %vm3546_vm14 = vcmp.lt.f32.partialorder %v3520_v26, 1.0  ;;  %v3660_v51 = vsub.f32 1.0, %v3520_v26  ;;  %v3658_v48 = vsub.f32 1.0, %v3514_v60  ;;  %v7121_v26 = vld [vmem:[#allocation9_spill] sm:$0xff] }
 0x452   : > { %v3560_v19 = vsel %vm3544_vm15, 1, %v5365_v34  ;;  %v3562_v21 = vsel %vm3546_vm14, 1, %v5365_v34  ;;  %vm7123_vm14 = vmmov %vm7119_vm7 }
 0x453   : > { %v3610_v40 = vrot.slane %v3560_v19, %v7116_v20  ;;  %v3619_v59 = vrot.slane %v3562_v21, %v7117_v24  ;;  %v3733_v50 = vrot.slane %v3660_v51, %v7117_v24  ;;  %v3724_v38 = vrot.slane %v3658_v48, %v7116_v20 }
 0x454   : > { %v3517_v3 = vpop.xlane.xlu0 %3516  ;;  %v3490_v62 = vpop.xlane.xlu1 %3489 }
 0x455   : > { %vm3545_vm12 = vcmp.lt.f32.partialorder %v3517_v3, 1.0  ;;  %v3659_v17 = vsub.f32 1.0, %v3517_v3  ;;  %vm3536_vm0 = vcmp.lt.f32.partialorder %v3490_v62, 1.0  ;;  %v3650_v56 = vsub.f32 1.0, %v3490_v62 }
 0x456   : > { %v3561_v46 = vsel %vm3545_vm12, 1, %v5365_v34  ;;  %v3552_v63 = vsel %vm3536_vm0, 1, %v5365_v34  ;;  %vm7122_vm12 = vmmov %vm7119_vm7 }
 0x457   : > { %v3614_v61 = vrot.slane %v3561_v46, %v7115_v39  ;;  %v3728_v58 = vrot.slane %v3659_v17, %v7115_v39  ;;  %v3571_v33 = vrot.slane %v3552_v63, %v7116_v20  ;;  %v3685_v23 = vrot.slane %v3650_v56, %v7116_v20  ;;  %vm7124_vm0 = vmmov %vm7120_vm8  ;;  %v7126_v56 = vld [vmem:[#allocation7_spill] sm:$0xff] }
 0x458   : > { %v3493_v29 = vpop.xlane.xlu0 %3492  ;;  %v3523_v53 = vpop.xlane.xlu1 %3522 }
 0x459   : > { %vm3537_vm11 = vcmp.lt.f32.partialorder %v3493_v29, 1.0  ;;  %vm3547_vm1 = vcmp.lt.f32.partialorder %v3523_v53, 1.0  ;;  %v3651_v6 = vsub.f32 1.0, %v3493_v29  ;;  %v3615_v11 = vsel %vm7118_vm10, %v3614_v61, %v3610_v40 }
 0x45a   : > { %v3553_v5 = vsel %vm3537_vm11, 1, %v5365_v34  ;;  %v3563_v16 = vsel %vm3547_vm1, 1, %v5365_v34  ;;  %v3661_v25 = vsub.f32 1.0, %v3523_v53  ;;  %v3729_v43 = vsel %vm7119_vm7, %v3728_v58, %v3724_v38 }
 0x45b   : > { %v3575_v45 = vrot.slane %v3553_v5, %v7115_v39  ;;  %v3689_v32 = vrot.slane %v3651_v6, %v7115_v39  ;;  %v3620_v1 = vsel %vm7120_vm8, %v3619_v59, %v3615_v11  ;;  %v3624_v60 = vrot.slane %v3563_v16, %v7121_v26  ;;  %v7127_v16 = vld [vmem:[#allocation13_spill] sm:$0xff] }
 0x45c   : > { %v3496_v27 = vpop.xlane.xlu0 %3495  ;;  %v3526_v22 = vpop.xlane.xlu1 %3525  ;;  %v3738_v51 = vrot.slane %v3661_v25, %v7121_v26  ;;  %v3734_v20 = vsel %vm7124_vm0, %v3733_v50, %v3729_v43  ;;  %vm7125_vm11 = vcmask 261312   ;;  %vm7131_vm8 = vcmask 326912  }
 0x45d   : > { %vm3538_vm9 = vcmp.lt.f32.partialorder %v3496_v27, 1.0  ;;  %v3652_v9 = vsub.f32 1.0, %v3496_v27  ;;  %vm3548_vm13 = vcmp.lt.f32.partialorder %v3526_v22, 1.0  ;;  %v3662_v3 = vsub.f32 1.0, %v3526_v22  ;;  %vm7128_vm10 = vmmov %vm7125_vm11 }
 0x45e   : > { %v3554_v10 = vsel %vm3538_vm9, 1, %v5365_v34  ;;  %v3564_v19 = vsel %vm3548_vm13, 1, %v5365_v34  ;;  %v3576_v61 = vsel %vm7122_vm12, %v3575_v45, %v3571_v33  ;;  %v3690_v48 = vsel %vm7123_vm14, %v3689_v32, %v3685_v23  ;;  %vm7129_vm9 = vmmov %vm7124_vm0 }
 0x45f   : > { %v3580_v29 = vrot.slane %v3554_v10, %v7117_v24  ;;  %v3694_v53 = vrot.slane %v3652_v9, %v7117_v24  ;;  %v3625_v63 = vsel %vm7125_vm11, %v3624_v60, %v3620_v1  ;;  %v3629_v6 = vrot.slane %v3564_v19, %v7126_v56  ;;  %vm7130_vm13 = vmmov %vm7124_vm0  ;;  %v7133_v1 = vld [vmem:[#allocation12_spill] sm:$0xff] }
 0x460   : > { %v3499_v62 = vpop.xlane.xlu0 %3498  ;;  %v3529_v46 = vpop.xlane.xlu1 %3528  ;;  %v3743_v59 = vrot.slane %v3662_v3, %v7126_v56  ;;  %v3739_v50 = vsel %vm7128_vm10, %v3738_v51, %v3734_v20  ;;  %vm7135_vm12 = vmmov %vm7128_vm10  ;;  %vm7136_vm14 = vcmask 392512  }
 0x461   : > { %vm3539_vm3 = vcmp.lt.f32.partialorder %v3499_v62, 1.0  ;;  %v3653_v17 = vsub.f32 1.0, %v3499_v62  ;;  %vm3549_vm15 = vcmp.lt.f32.partialorder %v3529_v46, 1.0  ;;  %v3663_v58 = vsub.f32 1.0, %v3529_v46 }
 0x462   : > { %v3555_v21 = vsel %vm3539_vm3, 1, %v5365_v34  ;;  %v3565_v40 = vsel %vm3549_vm15, 1, %v5365_v34  ;;  %v3581_v38 = vsel %vm7129_vm9, %v3580_v29, %v3576_v61  ;;  %v3695_v33 = vsel %vm7130_vm13, %v3694_v53, %v3690_v48  ;;  %vm7132_vm3 = vmmov %vm7131_vm8 }
 0x463   : > { %v3585_v22 = vrot.slane %v3555_v21, %v7121_v26  ;;  %v3699_v11 = vrot.slane %v3653_v17, %v7121_v26  ;;  %v3634_v25 = vrot.slane %v3565_v40, %v7127_v16  ;;  %v3748_v9 = vrot.slane %v3663_v58, %v7127_v16  ;;  %vm7134_vm15 = vmmov %vm7128_vm10  ;;  %v7139_v58 = vld [vmem:[#allocation8_spill] sm:$0xff] }
 0x464   : > { %v3502_v5 = vpop.xlane.xlu0 %3501  ;;  %v3532_v27 = vpop.xlane.xlu1 %3531  ;;  %v3630_v10 = vsel %vm7131_vm8, %v3629_v6, %v3625_v63  ;;  %v3744_v43 = vsel %vm7132_vm3, %v3743_v59, %v3739_v50  ;;  %vm7138_vm10 = vcmask 458112   ;;  %vm7140_vm13 = vmmov %vm7132_vm3 }
 0x465   : > { %vm3540_vm1 = vcmp.lt.f32.partialorder %v3502_v5, 1.0  ;;  %vm3550_vm7 = vcmp.lt.f32.partialorder %v3532_v27, 1.0  ;;  %v3654_v45 = vsub.f32 1.0, %v3502_v5  ;;  %v3664_v3 = vsub.f32 1.0, %v3532_v27 }
 0x466   : > { %v3556_v23 = vsel %vm3540_vm1, 1, %v5365_v34  ;;  %v3566_v32 = vsel %vm3550_vm7, 1, %v5365_v34  ;;  %v3586_v51 = vsel %vm7134_vm15, %v3585_v22, %v3581_v38  ;;  %v3700_v19 = vsel %vm7135_vm12, %v3699_v11, %v3695_v33  ;;  %vm7137_vm1 = vmmov %vm7136_vm14 }
 0x467   : > { %v3639_v60 = vrot.slane %v3566_v32, %v7133_v1  ;;  %v3635_v17 = vsel %vm7136_vm14, %v3634_v25, %v3630_v10  ;;  %v3590_v29 = vrot.slane %v3556_v23, %v7126_v56  ;;  %v3749_v61 = vsel %vm7137_vm1, %v3748_v9, %v3744_v43  ;;  %vm7142_vm12 = vmmov %vm7138_vm10 }
 0x468   : > { %v3505_v62 = vpop.xlane.xlu0 %3504  ;;  %v3535_v46 = vpop.xlane.xlu1 %3534  ;;  %v3704_v48 = vrot.slane %v3654_v45, %v7126_v56  ;;  %v3753_v6 = vrot.slane %v3664_v3, %v7133_v1  ;;  %vm7141_vm7 = vcmask 523712   ;;  %vm7143_vm14 = vmmov %vm7137_vm1 }
 0x469   : > { %vm3541_vm0 = vcmp.lt.f32.partialorder %v3505_v62, 1.0  ;;  %v3655_v21 = vsub.f32 1.0, %v3505_v62  ;;  %vm3551_vm11 = vcmp.lt.f32.partialorder %v3535_v46, 1.0  ;;  %v3665_v40 = vsub.f32 1.0, %v3535_v46 }
 0x46a   : > { %v3557_v53 = vsel %vm3541_vm0, 1, %v5365_v34  ;;  %v3567_v20 = vsel %vm3551_vm11, 1, %v5365_v34  ;;  %v3640_v63 = vsel %vm7138_vm10, %v3639_v60, %v3635_v17  ;;  %v3591_v38 = vsel %vm7140_vm13, %v3590_v29, %v3586_v51  ;;  %vm7144_vm11 = vmmov %vm7137_vm1 }
 0x46b   : > { %v3595_v59 = vrot.slane %v3557_v53, %v7127_v16  ;;  %v3644_v5 = vrot.slane %v3567_v20, %v7139_v58  ;;  %v3709_v11 = vrot.slane %v3655_v21, %v7127_v16  ;;  %v3758_v25 = vrot.slane %v3665_v40, %v7139_v58  ;;  %vm7145_vm1 = vmmov %vm7141_vm7 }
 0x46c   : > { %v3508_v27 = vpop.xlane.xlu0 %3507  ;;  %v3511_v22 = vpop.xlane.xlu1 %3510  ;;  %v3705_v23 = vsel %vm7132_vm3, %v3704_v48, %v3700_v19  ;;  %v3754_v10 = vsel %vm7142_vm12, %v3753_v6, %v3749_v61  ;;  %v5366_v53 = vmov 0.0   ;;  %vm7147_vm13 = vmmov %vm7145_vm1  ;;  %vm3771_vm3 = vcmask 517120  }
 0x46d   : > { %vm3542_vm9 = vcmp.lt.f32.partialorder %v3508_v27, 1.0  ;;  %v3656_v50 = vsub.f32 1.0, %v3508_v27  ;;  %v3645_v33 = vsel %vm7141_vm7, %v3644_v5, %v3640_v63  ;;  %vm3543_vm8 = vcmp.lt.f32.partialorder %v3511_v22, 1.0  ;;  %vm7148_vm7 = vmmov %vm7145_vm1 }
 0x46e   : > { %v3558_v9 = vsel %vm3542_vm9, 1, %v5365_v34  ;;  %vm3647_vm15 = vcmp.ne.s32.totalorder %v3645_v33, 0  ;;  %v3596_v43 = vsel %vm7143_vm14, %v3595_v59, %v3591_v38  ;;  %v3559_v60 = vsel %vm3543_vm8, 1, %v5365_v34  ;;  %vm7146_vm9 = vmmov %vm7138_vm10 }
 0x46f   : > { %v3600_v45 = vrot.slane %v3558_v9, %v7133_v1  ;;  %v3714_v32 = vrot.slane %v3656_v50, %v7133_v1  ;;  %v3657_v3 = vsub.f32 1.0, %v3511_v22  ;;  %vm3649_vm0 = vmand %vm3467_vm4, %vm3647_vm15  ;;  %v3710_v62 = vsel %vm7144_vm11, %v3709_v11, %v3705_v23  ;;  %v7154_v9 = vld [vmem:[#allocation11_spill] sm:$0xff] (%p3440_p0) }
 0x470   : > { %v3759_v46 = vsel %vm7145_vm1, %v3758_v25, %v3754_v10  ;;  %v3605_v19 = vrot.slane %v3559_v60, %v7139_v58  ;;  %v3929_v21 = vsel %vm3649_vm0, 1.0, %v5366_v53  ;;  %vm7149_vm15 = vcmask 1041409   ;;  %v7151_v25 = vld [vmem:[#allocation4_spill] sm:$0xff] }
 0x471   : > { %v3601_v51 = vsel %vm7138_vm10, %v3600_v45, %v3596_v43  ;;  %v3715_v17 = vsel %vm7146_vm9, %v3714_v32, %v3710_v62  ;;  %v3719_v29 = vrot.slane %v3657_v3, %v7139_v58  ;;  %v3763_v61 = vsel %vm3649_vm0, %v3759_v46, 0.0  ;;  %vm7150_vm12 = vmmov %vm7149_vm15 }
 0x472   : > { %v3606_v34 = vsel %vm7147_vm13, %v3605_v19, %v3601_v51  ;;  %v3765_v48 = vmul.f32 %v3763_v61, %v3763_v61  ;;  %v3781_v20 = vrot.slane %v3929_v21, 7  ;;  %vm3787_vm14 = vcmp.eq.s32.totalorder %v7151_v25, %v3446_v57  ;;  %v7155_v57 = vld [vmem:[#allocation10_spill] sm:$0xff] (%p3440_p0) }
 0x473   : > { %vm3646_vm4 = vcmp.ne.s32.totalorder %v3606_v34, 0  ;;  %v3720_v55 = vsel %vm7148_vm7, %v3719_v29, %v3715_v17  ;;  %v3792_v23 = vsel (%p3440_p0), %vm3421_vm2, %v7154_v9, 0.0  ;;  %v3795_v45 = vsel (%p3440_p0), %vm3421_vm2, %v7155_v57, 0.0 }
 0x474   : > { %vm3648_vm8 = vmand %vm3466_vm5, %vm3646_vm4  ;;  %v3768_v5 = vrot.slane %v3765_v48, 7  ;;  %v5367_v46 = vmov (%p3440_p0), 0   ;;  %vm3857_vm5 = vcmask (%p3440_p0), 1040384   ;;  %vm3860_vm0 = vcmask (%p3440_p0), 25600  }
 0x475   : > { %v3928_v40 = vsel %vm3648_vm8, 1.0, %v5366_v53  ;;  %v3762_v63 = vsel %vm3648_vm8, %v3720_v55, 0.0  ;;  %5329 = vset.pattern.permute.xlu0 (%p3440_p0), %v5367_v46  ;;  %5330 = vset.pattern.permute.xlu1 (%p3440_p0), %v5367_v46 }
 0x476   : > { %v3782_v6 = vsel %vm7149_vm15, %v3781_v20, %v3928_v40  ;;  %v3764_v59 = vmul.f32 %v3762_v63, %v3762_v63 }
 0x477   : > { %v3784_v27 = vsel %vm3771_vm3, %v3782_v6, 0.0 }
 0x478   : > { %3785 = vadd.xlane.f32.xlu1 %v3784_v27  ;;  %v3769_v22 = vsel %vm7150_vm12, %v3768_v5, %v3764_v59 }
 0x479   : > { %v3772_v11 = vsel %vm3771_vm3, %v3769_v22, 0.0 }
 0x47a   : > { %3773 = vadd.xlane.f32.xlu0 %v3772_v11 }
 0x47e   :  { %3793 = vadd.xlane.f32.xlu0 (%p3440_p0), %v3792_v23 }
 0x482   :  { %3796 = vadd.xlane.f32.xlu0 (%p3440_p0), %v3795_v45 }
 0x503   :  { %3442 = sbr.rel (!%p3440_p0) target bundleno = 944 (0x3b0), region = 35 }
 0x505   : > { %v3786_v50 = vpop.xlane.xlu1 %3785 }
 0x506   : > { %v3791_v0 = vsel %vm3787_vm14, %v3786_v50, %v5351_v4  }
 0x507   : > { %v3774_v38 = vpop.xlane.xlu0 %3773  ;;  %v7152_v4 = vmov %v3791_v0  ;;  %5331 = vrcp.f32 (%p3440_p0), %v3791_v0 }
 0x508   : > { %v3790_v33 = vsel %vm3787_vm14, %v3774_v38, %v5355_v14   ;;  %5333 = vrcp.f32 (%p3440_p0), %v6683_v47 }
 0x509   : > { %v7153_v14 = vmov %v3790_v33  ;;  %5335 = vrcp.f32 (%p3440_p0), %v6685_v7 }
 0x50a   :  { %v7156_v14 = vld [vmem:[#allocation3_spill] sm:$0xff] }
 0x50b   :  { %v3811_v32 = vsub.s32 0, %v7156_v14  ;;  %v3818_v60 = vsub.s32 1, %v7156_v14  ;;  %v3794_v35 = vpop.xlane.xlu0 %3793 }
 0x50c   :  { %vm3798_vm6 = vcmp.ge.f32.partialorder %v3794_v35, 10.0 }
 0x50f   :  { %v3797_v13 = vpop.xlane.xlu0 %3796 }
 0x510   :  { %vm3799_vm2 = vcmp.ge.f32.partialorder %v3797_v13, 10.0 }
 0x511   :  { %v5332_v10 = vpop.eup %5331 }
 0x512   :  { %v3807_v43 = vmul.f32 %v5332_v10, %v3790_v33  ;;  %v5334_v52 = vpop.eup %5333 }
 0x513   :  { %v3801_v28 = vmul.f32 %v5334_v52, %v6679_v12  ;;  %v5336_v18 = vpop.eup %5335 }
 0x514   :  { %v3812_v3 = vrot.slane %v3807_v43, %v3811_v32  ;;  %v3819_v62 = vrot.slane %v3807_v43, %v3818_v60  ;;  %v3803_v30 = vmul.f32 %v5336_v18, %v6681_v41 }
 0x515   :  { %v3804_v37 = vsel %vm3798_vm6, %v3801_v28, 0.0 }
 0x516   :  { %3814 = vbcast.lane.b32.xlu1 %v3812_v3, 256  ;;  %v3832_v36 = vrot.slane %v3804_v37, %v7157_v42  ;;  %v3805_v31 = vsel %vm3799_vm2, %v3803_v30, 0.0 }
 0x517   :  { %v3836_v12 = vrot.slane %v3805_v31, %v7157_v42 }
 0x51a   :  { %3821 = vbcast.lane.b32.xlu1 %v3819_v62, 256 }
 0x588   :  { %v3815_v15 = vpop.permute.xlu1 %3814 }
 0x589   :  { %v3825_v44 = vsel %vm3798_vm6, %v3815_v15, 0.0 }
 0x58a   :  { %3842 = vperm.xlu0 %5329, %v3825_v44  }
 0x58c   :  { %v3822_v54 = vpop.permute.xlu1 %3821 }
 0x58d   :  { %v3826_v49 = vsel %vm3799_vm2, %v3822_v54, 0.0 }
 0x58e   :  { %3845 = vperm.xlu1 %5330, %v3826_v49  }
 0x609   :  { %v3843_v8 = vpop.permute.xlu0 %3842 }
 0x60a   :  { %v3850_v2 = vrot.slane %v3843_v8, %v7157_v42 }
 0x60c   :  { %v3858_v4 = vsel %vm3857_vm5, %v3832_v36, %v3850_v2 }
 0x60d   :  { %3861 = vst.msk [vmem:[%s6895_s2] sm:$0x3] %vm3860_vm0, %v3858_v4  ;;  %v3846_v47 = vpop.permute.xlu1 %3845 }
 0x60e   :  { %v3854_v7 = vrot.slane %v3846_v47, %v7157_v42 }
 0x610   :  { %v3859_v39 = vsel %vm3857_vm5, %v3836_v12, %v3854_v7 }
 0x611   :  { %3862 = vst.msk [vmem:[%s6895_s2 + $0x2] sm:$0x3] %vm3860_vm0, %v3859_v39 }

</bundles_post_ra>
